<compile_context>
chip_gen: v7x
topology: tpu7x:2x2x1
jax: 0.10.0
libtpu: 0.0.40
codegen_flags: <defaults>
</compile_context>

<pallas_src>
import functools

import jax
import jax.numpy as jnp
from jax import lax
from jax.experimental import pallas as pl
from jax.experimental.pallas import tpu as pltpu


# ----------------------------------------------------------------------------
# Small helpers
# ----------------------------------------------------------------------------
def _round_up(x, m):
    return (x + m - 1) // m * m


def _vmem_budget_bytes():
    """Per-generation VMEM budget: half of physical, capped at 64 MiB."""
    cap = 64 * 1024 * 1024
    try:
        cap = int(pltpu.get_tpu_info().vmem_capacity_bytes)
    except Exception:
        pass
    return min(cap // 2, 64 * 1024 * 1024)


_VMEM_BUDGET = _vmem_budget_bytes()


def _pick_tm(M, Kp, Cp, budget):
    """Pick the M tile. Weight (Kp, Cp) bf16 stays resident; patches/out double-buffered."""

    def need(tm):
        return (2 * tm * Kp * 2      # double-buffered bf16 patch tiles
                + 2 * Kp * Cp * 2    # bf16 weight (counted x2 conservatively)
                + 2 * tm * Cp * 2    # double-buffered bf16 output tiles
                + 2 * 8 * Cp * 4)    # f32 bias (padded to 8 sublanes, x2 buffers)

    tm = 128
    for cand in (2048, 1024, 512, 256, 128):
        if need(cand) <= budget:
            tm = cand
            break
    if M <= tm:
        if M >= 256:
            # Split into (at least) two tiles so the parallel M axis can feed two cores.
            tm = _round_up(pl.cdiv(M, 2), 8)
        else:
            tm = M  # full-dim block (valid even when M is not a multiple of 8)
    return tm, need(tm)


# ----------------------------------------------------------------------------
# Pallas kernel: single-shot GEMM (full-K weight resident) + bias + optional ReLU.
# ----------------------------------------------------------------------------
def _gemm_bias_act_kernel(p_ref, w_ref, b_ref, o_ref, *, apply_relu):
    # p_ref: (tm, Kp) bf16 | w_ref: (Kp, Cp) bf16 | b_ref: (1, Cp) f32 | o_ref: (tm, Cp)
    acc = jnp.dot(p_ref[...], w_ref[...], preferred_element_type=jnp.float32)
    acc = acc + b_ref[...]
    if apply_relu:
        acc = jnp.maximum(acc, 0.0)
    o_ref[...] = acc.astype(o_ref.dtype)


def gemm_bias_act(patches, w_eff, bias_eff, *, relu, out_dtype):
    """out[:, :Cout] = act(patches @ w_eff + bias_eff); K/Cout zero-padded to 128."""
    M, K = patches.shape
    _, Cout = w_eff.shape
    Kp = _round_up(K, 128)
    Cp = _round_up(Cout, 128)

    p = patches
    if Kp != K:
        p = jnp.pad(p, ((0, 0), (0, Kp - K)))
    p = p.astype(jnp.bfloat16)
    w = w_eff
    if Kp != K or Cp != Cout:
        w = jnp.pad(w, ((0, Kp - K), (0, Cp - Cout)))
    w = w.astype(jnp.bfloat16)
    b = bias_eff
    if Cp != Cout:
        b = jnp.pad(b, (0, Cp - Cout))
    b = b.reshape(1, Cp).astype(jnp.float32)

    tm, need = _pick_tm(M, Kp, Cp, _VMEM_BUDGET)
    grid = (pl.cdiv(M, tm),)

    out_itemsize = jnp.dtype(out_dtype).itemsize
    cost = pl.CostEstimate(
        flops=2 * M * Kp * Cp,
        transcendentals=0,
        bytes_accessed=M * Kp * 2 + Kp * Cp * 2 + M * Cp * out_itemsize + Cp * 4)

    out = pl.pallas_call(
        functools.partial(_gemm_bias_act_kernel, apply_relu=relu),
        out_shape=jax.ShapeDtypeStruct((M, Cp), out_dtype),
        grid_spec=pltpu.PrefetchScalarGridSpec(
            num_scalar_prefetch=0,
            grid=grid,
            in_specs=[
                pl.BlockSpec((tm, Kp), lambda i: (i, 0)),
                pl.BlockSpec((Kp, Cp), lambda i: (0, 0)),   # resident weight
                pl.BlockSpec((1, Cp), lambda i: (0, 0)),    # resident bias
            ],
            out_specs=pl.BlockSpec((tm, Cp), lambda i: (i, 0)),
        ),
        compiler_params=pltpu.CompilerParams(
            dimension_semantics=("parallel",),
            vmem_limit_bytes=int(need + 4 * 1024 * 1024)),
        cost_estimate=cost,
    )(p, w, b)

    if Cp != Cout:
        out = out[:, :Cout]
    return out


# ----------------------------------------------------------------------------
# Conv (Conv2d + BN(eval) + ReLU) building blocks, NHWC activations in bf16.
# ----------------------------------------------------------------------------
def fold_bn_matrix(p, eps=1e-3):
    """Fold conv bias + eval BN into a [kh*kw*Cin, Cout] f32 weight matrix and f32 bias."""
    w = p["w"]  # OIHW
    cout = w.shape[0]
    scale = p["gamma"] / jnp.sqrt(p["var"] + eps)
    w_mat = jnp.transpose(w, (2, 3, 1, 0)).reshape(-1, cout)
    w_eff = (w_mat * scale[None, :]).astype(jnp.float32)
    b_eff = ((p["b"] - p["mean"]) * scale + p["beta"]).astype(jnp.float32)
    return w_eff, b_eff


def conv_block(x, p, *, stride, pad):
    """x: [N,H,W,Cin] bf16 -> [N,Ho,Wo,Cout] bf16 (Conv + BN + ReLU)."""
    cout, cin, kh, kw = p["w"].shape
    w_eff, b_eff = fold_bn_matrix(p)
    N, H, W, _ = x.shape

    if kh == 1 and kw == 1 and pad == 0:
        xs = x[:, ::stride, ::stride, :]
        Ho, Wo = xs.shape[1], xs.shape[2]
        patches = xs.reshape(N * Ho * Wo, cin)
    else:
        Ho = (H + 2 * pad - kh) // stride + 1
        Wo = (W + 2 * pad - kw) // stride + 1
        xp = jnp.pad(x, ((0, 0), (pad, pad), (pad, pad), (0, 0)))
        # bf16 NHWC im2col (activations already bf16 -> no f32 blow-up).
        # TODO(synk): move this patch gather into the kernel to avoid materializing it.
        slabs = [xp[:, ki:ki + (Ho - 1) * stride + 1:stride,
                     kj:kj + (Wo - 1) * stride + 1:stride, :]
                 for ki in range(kh) for kj in range(kw)]
        patches = jnp.stack(slabs, axis=3).reshape(N * Ho * Wo, kh * kw * cin)

    y = gemm_bias_act(patches, w_eff, b_eff, relu=True, out_dtype=jnp.bfloat16)
    return y.reshape(N, Ho, Wo, cout)


def maxpool_nhwc(x, k, s, pad):
    return lax.reduce_window(
        x, jnp.asarray(-jnp.inf, dtype=x.dtype), lax.max,
        window_dimensions=(1, k, k, 1), window_strides=(1, s, s, 1),
        padding=((0, 0), (pad, pad), (pad, pad), (0, 0)))


def inception_block(x, p):
    N, H, W, cin = x.shape
    # (a) Fuse the three 1x1 convs that read the same input into one lane-dense GEMM.
    w1, b1 = fold_bn_matrix(p["b1"])
    w2r, b2r = fold_bn_matrix(p["b2r"])
    w3r, b3r = fold_bn_matrix(p["b3r"])
    wcat = jnp.concatenate([w1, w2r, w3r], axis=1)
    bcat = jnp.concatenate([b1, b2r, b3r], axis=0)
    fused = gemm_bias_act(x.reshape(N * H * W, cin), wcat, bcat,
                          relu=True, out_dtype=jnp.bfloat16)
    c1 = p["b1"]["w"].shape[0]
    c2r = p["b2r"]["w"].shape[0]
    y1 = fused[:, :c1].reshape(N, H, W, c1)
    y2r = fused[:, c1:c1 + c2r].reshape(N, H, W, c2r)
    y3r = fused[:, c1 + c2r:].reshape(N, H, W, -1)
    # (b) kxk convs on the reduce outputs.
    y2 = conv_block(y2r, p["b2"], stride=1, pad=1)   # 3x3
    y3 = conv_block(y3r, p["b3"], stride=1, pad=2)   # 5x5
    # (c) Pool branch: maxpool(3,1,1) then 1x1 projection (different input -> own GEMM).
    y4 = conv_block(maxpool_nhwc(x, 3, 1, 1), p["b4"], stride=1, pad=0)
    return jnp.concatenate([y1, y2, y3, y4], axis=-1)


# ----------------------------------------------------------------------------
# Full GoogLeNet forward (inference): Pallas path (NHWC/bf16 internally).
# ----------------------------------------------------------------------------
@jax.jit
def googlenet_pallas(params, x_nchw):
    x = jnp.transpose(x_nchw, (0, 2, 3, 1)).astype(jnp.bfloat16)   # NCHW -> NHWC once
    x = conv_block(x, params["conv1"], stride=2, pad=3)
    x = maxpool_nhwc(x, 3, 2, 0)
    x = conv_block(x, params["conv2"], stride=1, pad=0)
    x = conv_block(x, params["conv2a"], stride=1, pad=2)
    x = maxpool_nhwc(x, 3, 2, 0)
    x = inception_block(x, params["i3a"])
    x = inception_block(x, params["i3b"])
    x = maxpool_nhwc(x, 3, 2, 0)
    x = inception_block(x, params["i4a"])
    # TODO(synk): aux classifier 1 (training only) skipped.
    x = inception_block(x, params["i4b"])
    x = inception_block(x, params["i4c"])
    x = inception_block(x, params["i4d"])
    # TODO(synk): aux classifier 2 (training only) skipped.
    x = inception_block(x, params["i4e"])
    x = maxpool_nhwc(x, 3, 2, 0)
    x = inception_block(x, params["i5a"])
    x = inception_block(x, params["i5b"])
    feat = jnp.mean(x.astype(jnp.float32), axis=(1, 2))            # AdaptiveAvgPool2d(1)
    # Dropout is identity at inference. Final Linear via the same Pallas GEMM (no ReLU).
    logits = gemm_bias_act(feat.astype(jnp.bfloat16), params["fc"]["w"].T,
                           params["fc"]["b"], relu=False, out_dtype=jnp.float32)
    return logits


# ----------------------------------------------------------------------------
# f32 NCHW reference (PyTorch semantics, eval mode).
# ----------------------------------------------------------------------------
def conv_bn_relu_ref(x, p, stride, pad, eps=1e-3):
    y = lax.conv_general_dilated(
        x, p["w"], window_strides=(stride, stride),
        padding=((pad, pad), (pad, pad)),
        dimension_numbers=("NCHW", "OIHW", "NCHW"))
    y = y + p["b"][None, :, None, None]
    y = (y - p["mean"][None, :, None, None]) / jnp.sqrt(p["var"] + eps)[None, :, None, None]
    y = y * p["gamma"][None, :, None, None] + p["beta"][None, :, None, None]
    return jnp.maximum(y, 0.0)


def maxpool_ref(x, k, s, pad):
    return lax.reduce_window(
        x, jnp.asarray(-jnp.inf, dtype=x.dtype), lax.max,
        window_dimensions=(1, 1, k, k), window_strides=(1, 1, s, s),
        padding=((0, 0), (0, 0), (pad, pad), (pad, pad)))


def inception_ref(x, p):
    b1 = conv_bn_relu_ref(x, p["b1"], 1, 0)
    b2 = conv_bn_relu_ref(conv_bn_relu_ref(x, p["b2r"], 1, 0), p["b2"], 1, 1)
    b3 = conv_bn_relu_ref(conv_bn_relu_ref(x, p["b3r"], 1, 0), p["b3"], 1, 2)
    b4 = conv_bn_relu_ref(maxpool_ref(x, 3, 1, 1), p["b4"], 1, 0)
    return jnp.concatenate([b1, b2, b3, b4], axis=1)


@jax.jit
def googlenet_ref(params, x):
    x = conv_bn_relu_ref(x, params["conv1"], 2, 3)
    x = maxpool_ref(x, 3, 2, 0)
    x = conv_bn_relu_ref(x, params["conv2"], 1, 0)
    x = conv_bn_relu_ref(x, params["conv2a"], 1, 2)
    x = maxpool_ref(x, 3, 2, 0)
    x = inception_ref(x, params["i3a"])
    x = inception_ref(x, params["i3b"])
    x = maxpool_ref(x, 3, 2, 0)
    x = inception_ref(x, params["i4a"])
    x = inception_ref(x, params["i4b"])
    x = inception_ref(x, params["i4c"])
    x = inception_ref(x, params["i4d"])
    x = inception_ref(x, params["i4e"])
    x = maxpool_ref(x, 3, 2, 0)
    x = inception_ref(x, params["i5a"])
    x = inception_ref(x, params["i5b"])
    feat = jnp.mean(x, axis=(2, 3))
    return feat @ params["fc"]["w"].T + params["fc"]["b"]


# ----------------------------------------------------------------------------
# Deterministic parameter construction.
# ----------------------------------------------------------------------------
def conv_params(key, cin, cout, k):
    kw_, kb, kg, kbe, km, kv = jax.random.split(key, 6)
    fan_in = cin * k * k
    return dict(
        w=jax.random.normal(kw_, (cout, cin, k, k), jnp.float32) * jnp.sqrt(2.0 / fan_in),
        b=0.02 * jax.random.normal(kb, (cout,), jnp.float32),
        gamma=1.0 + 0.05 * jax.random.normal(kg, (cout,), jnp.float32),
        beta=0.05 * jax.random.normal(kbe, (cout,), jnp.float32),
        mean=0.05 * jax.random.normal(km, (cout,), jnp.float32),
        var=1.0 + 0.05 * jnp.abs(jax.random.normal(kv, (cout,), jnp.float32)),
    )


def inception_params(key, cin, o1, r3, o3, r5, o5, pp):
    ks = jax.random.split(key, 6)
    return dict(
        b1=conv_params(ks[0], cin, o1, 1),
        b2r=conv_params(ks[1], cin, r3, 1),
        b2=conv_params(ks[2], r3, o3, 3),
        b3r=conv_params(ks[3], cin, r5, 1),
        b3=conv_params(ks[4], r5, o5, 5),
        b4=conv_params(ks[5], cin, pp, 1),
    )


if __name__ == "__main__":
    key = jax.random.PRNGKey(0)
    NUM_CLASSES = 10
    N, H, W = 2, 64, 64   # 64 is (close to) the smallest size surviving all maxpool stages
    keys = jax.random.split(key, 16)

    params = {
        "conv1": conv_params(keys[0], 3, 64, 7),
        "conv2": conv_params(keys[1], 64, 64, 1),
        "conv2a": conv_params(keys[2], 64, 192, 3),
        "i3a": inception_params(keys[3], 192, 64, 96, 128, 16, 32, 32),
        "i3b": inception_params(keys[4], 256, 128, 128, 192, 32, 96, 64),
        "i4a": inception_params(keys[5], 480, 192, 96, 208, 16, 48, 64),
        "i4b": inception_params(keys[6], 512, 160, 112, 224, 25, 64, 64),
        "i4c": inception_params(keys[7], 512, 128, 128, 256, 24, 64, 64),
        "i4d": inception_params(keys[8], 512, 112, 144, 288, 32, 64, 64),
        "i4e": inception_params(keys[9], 528, 256, 160, 320, 32, 128, 128),
        "i5a": inception_params(keys[10], 832, 256, 160, 320, 32, 128, 128),
        "i5b": inception_params(keys[11], 832, 384, 192, 384, 48, 128, 128),
        "fc": dict(
            w=jax.random.normal(keys[12], (NUM_CLASSES, 1024), jnp.float32) / jnp.sqrt(1024.0),
            b=0.02 * jax.random.normal(keys[13], (NUM_CLASSES,), jnp.float32),
        ),
    }
    x = jax.random.normal(keys[14], (N, 3, H, W), jnp.float32)

    # --- single Conv block sanity check (tight-ish; bf16 operands, f32 accumulation) ---
    x_nhwc = jnp.transpose(x, (0, 2, 3, 1)).astype(jnp.bfloat16)
    y1 = jax.block_until_ready(conv_block(x_nhwc, params["conv1"], stride=2, pad=3))
    y1_nchw = jnp.transpose(y1.astype(jnp.float32), (0, 3, 1, 2))
    ref1 = conv_bn_relu_ref(x, params["conv1"], 2, 3)
    assert y1_nchw.shape == ref1.shape, (y1_nchw.shape, ref1.shape)
    err1 = float(jnp.max(jnp.abs(y1_nchw - ref1)))
    assert err1 < 1e-1, f"conv1 max abs err {err1}"

    # --- full GoogLeNet forward (inference) ---
    logits = jax.block_until_ready(googlenet_pallas(params, x))
    ref = jax.block_until_ready(googlenet_ref(params, x))
    assert logits.shape == (N, NUM_CLASSES), logits.shape
    assert bool(jnp.all(jnp.isfinite(logits)))
    scale = float(jnp.max(jnp.abs(ref))) + 1e-6
    err = float(jnp.max(jnp.abs(logits - ref)))
    # ~24 sequential bf16 layers -> normalized tolerance.
    assert err <= 0.12 * scale + 0.02, f"logit max abs err {err} vs scale {scale}"

    print("KERNEL_OK")
</pallas_src>

<mosaic_0001>
module attributes {stable_mosaic.version = 11 : i64} {
  func.func @_gemm_bias_act_kernel(%arg0: i32, %arg1: memref<1024x256xbf16, #tpu.memory_space<vmem>>, %arg2: memref<256x128xbf16, #tpu.memory_space<vmem>>, %arg3: memref<1x128xf32, #tpu.memory_space<vmem>>, %arg4: memref<1024x128xbf16, #tpu.memory_space<vmem>>) attributes {dimension_semantics = [#tpu.dimension_semantics<parallel>], iteration_bounds = array<i64: 2>, scalar_prefetch = 0 : i64, scratch_operands = 0 : i64, tpu.core_type = #tpu.core_type<tc>, window_params = [{transform_indices = @transform_0, window_bounds = array<i64: 1024, 256>}, {pipeline_mode = #tpu.pipeline_mode<synchronous>, transform_indices = @transform_1, window_bounds = array<i64: 256, 128>}, {pipeline_mode = #tpu.pipeline_mode<synchronous>, transform_indices = @transform_2, window_bounds = array<i64: 1, 128>}, {transform_indices = @transform_3, window_bounds = array<i64: 1024, 128>}]} {
    %c0 = arith.constant 0 : index
    %c0_0 = arith.constant 0 : index
    %0 = vector.load %arg1[%c0, %c0_0] : memref<1024x256xbf16, #tpu.memory_space<vmem>>, vector<1024x256xbf16>
    %c0_1 = arith.constant 0 : index
    %c0_2 = arith.constant 0 : index
    %1 = vector.load %arg2[%c0_1, %c0_2] : memref<256x128xbf16, #tpu.memory_space<vmem>>, vector<256x128xbf16>
    %cst = arith.constant dense<0.000000e+00> : vector<1024x128xf32>
    %2 = tpu.matmul %0, %1, %cst {dimension_numbers = #tpu.dot_dimension_numbers<[1], [0], [0], [1], [0, 0, 1, 1], [], []>} : vector<1024x256xbf16>, vector<256x128xbf16>, vector<1024x128xf32> -> vector<1024x128xf32>
    %c0_3 = arith.constant 0 : index
    %c0_4 = arith.constant 0 : index
    %3 = vector.load %arg3[%c0_3, %c0_4] : memref<1x128xf32, #tpu.memory_space<vmem>>, vector<1x128xf32>
    %4 = vector.broadcast %3 : vector<1x128xf32> to vector<1024x128xf32>
    %5 = arith.addf %2, %4 : vector<1024x128xf32>
    %cst_5 = arith.constant 0.000000e+00 : f32
    %6 = vector.broadcast %cst_5 : f32 to vector<1024x128xf32>
    %7 = arith.maximumf %5, %6 : vector<1024x128xf32>
    %8 = arith.truncf %7 : vector<1024x128xf32> to vector<1024x128xbf16>
    %c0_6 = arith.constant 0 : index
    %c0_7 = arith.constant 0 : index
    %9 = vector.load %arg4[%c0_6, %c0_7] : memref<1024x128xbf16, #tpu.memory_space<vmem>>, vector<1024x128xbf16>
    tpu.vector_store %arg4[%c0_6, %c0_7], %8 {strides = array<i32>} : memref<1024x128xbf16, #tpu.memory_space<vmem>>, vector<1024x128xbf16>,
    return
  }
  func.func @transform_0(%arg0: i32) -> (i32, i32) {
    %c0_i32 = arith.constant 0 : i32
    %c0_i32_0 = arith.constant 0 : i32
    return %arg0, %c0_i32 : i32, i32
  }
  func.func @transform_1(%arg0: i32) -> (i32, i32) {
    %c0_i32 = arith.constant 0 : i32
    %c0_i32_0 = arith.constant 0 : i32
    %c0_i32_1 = arith.constant 0 : i32
    return %c0_i32, %c0_i32_0 : i32, i32
  }
  func.func @transform_2(%arg0: i32) -> (i32, i32) {
    %c0_i32 = arith.constant 0 : i32
    %c0_i32_0 = arith.constant 0 : i32
    %c0_i32_1 = arith.constant 0 : i32
    return %c0_i32, %c0_i32_0 : i32, i32
  }
  func.func @transform_3(%arg0: i32) -> (i32, i32) {
    %c0_i32 = arith.constant 0 : i32
    %c0_i32_0 = arith.constant 0 : i32
    return %arg0, %c0_i32 : i32, i32
  }
}

</mosaic_0001>

<bundles_post_ra>
// kernel: tpu_custom_call.1
= control target key start
LH: loop header
LB: loop body
LE: loop exit
PB: predicated region body
PF: predicated region fallthrough
CT: control target
= control target key end

     0   :  { %8 = vsyncpa [#allocation3], 0  ;;  %s4359_s0 = inlined_call_operand.hbm [shape: bf16[2048,256], index: 0, kind: input, shape index: {}]   ;;  %s4360_s1 = inlined_call_operand.hbm [shape: bf16[256,128], index: 1, kind: input, shape index: {}]   ;;  %s4361_s2 = inlined_call_operand.vmem [shape: f32[1,128], index: 2, kind: input, shape index: {}]   ;;  %s4362_s3 = inlined_call_operand.hbm [shape: bf16[2048,128], index: 3, kind: output, shape index: {}]  }
   0x1   :  { %10 = vsyncpa [#allocation3 + $0x1], 0 }
   0x2   :  { %11 = vsyncpa [#allocation6], 0 }
   0x3   :  { %12 = vsyncpa [#allocation4], 0 }
   0x4   :  { %14 = vsyncpa [#allocation4 + $0x1], 0  ;;  %s3790_s12 = smov 0   ;;  %s3792_s13 = smov 0  }
   0x5   :  { %s3794_s14 = smov 0   ;;  %s3796_s15 = smov 0  }
   0x6 LB: > { %s3811_s16 = sadd.s32 4294967295, %s3758_s15   ;;  %s2521_s17 = sadd.s32 4294967294, %s3758_s15   ;;  %s3758_s15 = sphi %s3796_s15, %s4382_s15   ;;  %s3754_s14 = sphi %s3794_s14, %s4381_s14   ;;  %s3750_s13 = sphi %s3792_s13, %s4380_s13   ;;  %s3746_s12 = sphi %s3790_s12, %s4379_s12  }
   0x7   : > { %p40_p0 = scmp.ne.s32.totalorder %s3750_s13, %s3746_s12  ;;  %p4363_p1 = scmp.eq.s32.totalorder %s3811_s16, 0 }
   0x8   : > { %p112_p3 = scmp.eq.s32.totalorder %s2521_s17, 1  ;;  %p2522_p5 = scmp.ge.s32.totalorder %s3758_s15, 1 }
   0x9   : > { %p3820_p4 = por %p4363_p1, %p40_p0  ;;  %p119_p7 = scmp.lt.s32.totalorder %s3758_s15, 3 }
   0xa   : > { %p3825_p6 = por %p112_p3, %p40_p0  ;;  %s3760_s21 = smov [#allocation5]  }
   0xb   : > { %s4366_s18 = scalar_select %p3820_p4, 1, 0 }
   0xc   : > { %s4367_s19 = scalar_select %p3825_p6, 1, 0 }
   0xd   : > { %p3830_p8 = pnand %p2522_p5, %p119_p7  ;;  %s131_s22 = sshll.u32 %s3760_s21, 4  ;;  %s3834_s22 = int_to_ptr.vmem [resolvable:$true] %s131_s22 }
   0xe   : > { %s3846_s24 = sadd.s32 1, %s3758_s15   ;;  %s27_s25 = sadd.s32 1, %s3754_s14 }
   0xf   : > { %s4368_s20 = scalar_select %p3830_p8, 1, 0 }
  0x10   : > { %p3365_p9 = pneg %p3830_p8  ;;  %s24_s26 = ssub.s32 %s3758_s15, %s3846_s24 }
  0x11   : > { %s3630_s29 = scalar_lea.hbm %s4360_s1, 2048 }
  0x12   : > { %p3841_p11 = pnand %p3365_p9, %p4363_p1  ;;  %p3631_p12 = scmp.ne.s32.totalorder %s4360_s1, %s3630_s29 }
  0x13   : > { %p3637_p5 = scmp.lt.u32.totalorder %s3630_s29, %s4360_s1 }
  0x14   : > { %p3632_p13 = pneg %p3841_p11 }
  0x16   : > { %p3633_p0 = pnand %p3632_p13, %p3631_p12 }
  0x18   : > { %p3634_p3 = pneg %p3633_p0 }
  0x1a   : > { %p3639_p7 = pnand %p3637_p5, %p3634_p3 }
  0x1c   : > { %3642 = shalt.err (!%p3639_p7)
}
  0x1d   : > { %s3643_s7 = scalar_lea.vmem %s3834_s22, 2048  ;;  %p3651_p2 = scmp.lt.s32.totalorder %s3834_s22, %s3834_s22 }
  0x1e   : > { %p3644_p9 = scmp.ne.s32.totalorder %s3834_s22, %s3643_s7  ;;  %p3652_p6 = scmp.lt.s32.totalorder %s3643_s7, %s3643_s7 }
  0x20   : > { %p3646_p10 = pnand %p3644_p9, %p3632_p13  ;;  %p3653_p4 = por %p3652_p6, %p3651_p2 }
  0x22   : > { %p3647_p1 = pneg %p3646_p10 }
  0x24   : > { %p3654_p8 = pnand %p3653_p4, %p3647_p1 }
  0x26   : > { %3657 = shalt.err (!%p3654_p8)
}
  0x27   : > { %s3761_s8 = smov 64   ;;  %s3762_s9 = smov 4  }
  0x28   : > { %3368 = dma.hbm_to_vmem [thread:$0]  (!%p3841_p11), %s4360_s1, 2048, %s3834_s22, [#allocation6], %s3761_s8, %s3761_s8, %s3762_s9  }
  0x29   : > { %p25_p2 = scmp.eq.s32.totalorder %s24_s26, 0  ;;  %p34_p1 = scmp.ne.s32.totalorder %s3754_s14, %s3750_s13 }
  0x2a   : > { %p35_p4 = scmp.eq.s32.totalorder %s3758_s15, 0  ;;  %p3378_p6 = scmp.lt.s32.totalorder %s3758_s15, 2 }
  0x2b   : > { %s3877_s17 = scalar_select %p25_p2, %s3754_s14, %s27_s25  }
  0x2c   : > { %p36_p8 = por %p35_p4, %p34_p1  ;;  %p4370_p10 = scmp.eq.s32.totalorder %s3811_s16, 1 }
  0x2d   : > { %s148_s27 = sand.u32 1, %s3754_s14   ;;  %s2812_s28 = sshll.u32 %s3758_s15, 14 }
  0x2e   : > { %p3881_p12 = por %p4370_p10, %p34_p1  ;;  %s2525_s29 = sshll.u32 %s148_s27, 10 }
  0x2f   : > { %s3890_s4 = scalar_lea.hbm %s4359_s0, %s2812_s28  ;;  %s152_s22 = scalar_lea.vmem [#allocation2], %s2525_s29 }
  0x30   : > { %s160_s25 = sshll.u32 %s152_s22, 4  ;;  %p3892_p11 = pnand %p3378_p6, %p36_p8  ;;  %s3896_s25 = int_to_ptr.vmem [resolvable:$true] %s160_s25 }
  0x31   : > { %s3898_s5 = scalar_lea.sflag [#allocation3], %s148_s27  ;;  %s3658_s6 = scalar_lea.hbm %s3890_s4, 16384 }
  0x32   : > { %p3659_p13 = scmp.ne.s32.totalorder %s3890_s4, %s3658_s6  ;;  %p3660_p0 = pneg %p3892_p11 }
  0x33   : > { %s3663_s9 = scalar_lea.hbm %s4359_s0, 32768  ;;  %p3664_p7 = scmp.lt.u32.totalorder %s3890_s4, %s4359_s0 }
  0x34   : > { %p3661_p3 = pnand %p3660_p0, %p3659_p13  ;;  %p3665_p9 = scmp.lt.u32.totalorder %s3663_s9, %s3658_s6 }
  0x35   : > { %p3667_p1 = scmp.lt.u32.totalorder %s3658_s6, %s3890_s4 }
  0x36   : > { %p3662_p5 = pneg %p3661_p3  ;;  %p3666_p2 = por %p3665_p9, %p3664_p7 }
  0x38   : > { %p3668_p4 = por %p3667_p1, %p3666_p2 }
  0x3a   : > { %p3669_p6 = pnand %p3668_p4, %p3662_p5 }
  0x3c   : > { %3672 = shalt.err (!%p3669_p6)
}
  0x3d   : > { %s3673_s27 = scalar_lea.vmem %s3896_s25, 16384  ;;  %s3763_s28 = smov [#allocation2]  }
  0x3e   : > { %p3674_p8 = scmp.ne.s32.totalorder %s3896_s25, %s3673_s27  ;;  %s3678_s29 = sshll.u32 %s3763_s28, 4  ;;  %s3679_s29 = int_to_ptr.vmem [resolvable:$false] %s3678_s29 }
  0x3f   : > { %s3680_s23 = scalar_lea.vmem %s3679_s29, 32768  ;;  %p3681_p3 = scmp.lt.s32.totalorder %s3896_s25, %s3679_s29 }
  0x40   : > { %p3676_p10 = pnand %p3674_p8, %p3660_p0  ;;  %p3682_p7 = scmp.lt.s32.totalorder %s3680_s23, %s3673_s27 }
  0x42   : > { %p3677_p13 = pneg %p3676_p10  ;;  %p3683_p9 = por %p3682_p7, %p3681_p3 }
  0x44   : > { %p3684_p2 = pnand %p3683_p9, %p3677_p13 }
  0x46   : > { %3687 = shalt.err (!%p3684_p2)
}
  0x47   : > { %s3764_s30 = smov 128   ;;  %s3765_s22 = smov 8  }
  0x48   : > { %3372 = dma.hbm_to_vmem [thread:$0]  (!%p3892_p11), %s3890_s4, 16384, %s3896_s25, %s3898_s5, %s3764_s30, %s3764_s30, %s3765_s22  }
  0x49   : > { %p4373_p0 = scmp.ne.s32.totalorder %s4368_s20, 0 }
  0x4a   : > { %s3929_s6 = sand.u32 (!%p4373_p0), 1, %s3750_s13   ;;  %p4374_p5 = scmp.ne.s32.totalorder (!%p4373_p0), %s4366_s18, 0 }
  0x4b   : > { %172 = sbr.rel (%p4373_p0) target bundleno = 634 (0x27a), region = 32  ;;  %s2530_s7 = sshll.u32 (!%p4373_p0), %s3929_s6, 10 }
  0x4c   : > { %s175_s8 = scalar_lea.sflag (!%p4373_p0), [#allocation3], %s3929_s6  ;;  %s3933_s9 = scalar_lea.vmem (!%p4373_p0), [#allocation2], %s2530_s7 }
  0x52   : > { %3733 = dma.done.wait (%p4374_p5), %s175_s8, 16384  }
  0x53   : > { %3735 = vsyncadd (%p4374_p5), %s175_s8, 4294950912  ;;  %p4375_p11 = scmp.eq.s32.totalorder %s3811_s16, 0 }
  0x55   : > { %3737 = dma.done.wait (%p4375_p11), [#allocation6], 2048   ;;  %p4376_p1 = pmov %p4375_p11 }
  0x56   : > { %v3766_v0 = vmov 0   ;;  %v3421_v1 = vld [vmem:[#allocation5] sm:$0xff]   ;;  %v3422_v2 = vld [vmem:[#allocation5 + $0x8] sm:$0xff]   ;;  %v3423_v3 = vld [vmem:[#allocation5 + $0x10] sm:$0xff]   ;;  %s2532_s4 = sshll.u32 %s3929_s6, 9  ;;  %s2941_s10 = sshll.u32 %s3811_s16, 13 }
  0x57   : > { %3739 = vsyncadd (%p4376_p1), [#allocation6], 4294965248  ;;  %1111 = vmatprep.subr.bf16.mxu0 %v3766_v0  ;;  %3325 = vmatprep.subr.bf16.mxu1 %v3766_v0  ;;  %v3424_v4 = vld [vmem:[#allocation5 + $0x18] sm:$0xff]   ;;  %v3425_v5 = vld [vmem:[#allocation5 + $0x20] sm:$0xff]   ;;  %s4099_s25 = scalar_lea.vmem [#allocation7], %s2532_s4  ;;  %s4311_s29 = scalar_lea.hbm %s4362_s3, %s2941_s10 }
  0x58   : > { %1112 = vmatpush1.bf16.msra.mxu0 %v3421_v1  ;;  %3341 = vmatpush1.bf16.msra.mxu1 %v3421_v1  ;;  %v3439_v6 = vld [vmem:[%s3933_s9 + $0x4] ss:$8 sps:$4 sm:$0xff]   ;;  %v3427_v9 = vld [vmem:[#allocation5 + $0x30] sm:$0xff]   ;;  %v3428_v10 = vld [vmem:[#allocation5 + $0x38] sm:$0xff]   ;;  %s2438_s11 = sshll.u32 %s4099_s25, 4  ;;  %s2425_s16 = scalar_lea.sflag [#allocation4], %s3929_s6  ;;  %s4313_s11 = int_to_ptr.vmem [resolvable:$true] %s2438_s11 }
  0x59   : > { %1113 = vmatprep.subr.bf16.mxu0 %v3766_v0  ;;  %3326 = vmatprep.subr.bf16.mxu1 %v3766_v0  ;;  %v3426_v7 = vld [vmem:[#allocation5 + $0x28] sm:$0xff]   ;;  %v3429_v11 = vld [vmem:[#allocation5 + $0x40] sm:$0xff]   ;;  %v3431_v13 = vld [vmem:[#allocation5 + $0x50] sm:$0xff]   ;;  %s3688_s23 = scalar_lea.vmem %s4313_s11, 8192  ;;  %s3767_s30 = smov [#allocation7]  }
  0x5a   : > { %v3442_v8 = vld [vmem:[%s3933_s9 + $0x204] ss:$8 sps:$4 sm:$0xff]   ;;  %1143 = vmatprep.mubr.bf16.mxu0 %v3439_v6  ;;  %v3432_v14 = vld [vmem:[#allocation5 + $0x58] sm:$0xff]   ;;  %v3435_v17 = vld [vmem:[#allocation5 + $0x70] sm:$0xff]   ;;  %p3689_p4 = scmp.ne.s32.totalorder %s4313_s11, %s3688_s23  ;;  %s3692_s22 = sshll.u32 %s3767_s30, 4  ;;  %s3693_s22 = int_to_ptr.vmem [resolvable:$false] %s3692_s22 }
  0x5b   : > { %1399 = vmatprep.mubr.bf16.mxu1 %v3442_v8  ;;  %v3430_v12 = vld [vmem:[#allocation5 + $0x48] sm:$0xff]   ;;  %v3433_v15 = vld [vmem:[#allocation5 + $0x60] sm:$0xff]   ;;  %v3436_v18 = vld [vmem:[#allocation5 + $0x78] sm:$0xff]   ;;  %s3694_s7 = scalar_lea.vmem %s3693_s22, 16384  ;;  %p3695_p10 = scmp.lt.s32.totalorder %s4313_s11, %s3693_s22 }
  0x5c   : > { %1114 = vmatpush1.bf16.msra.mxu0 %v3422_v2  ;;  %3342 = vmatpush1.bf16.msra.mxu1 %v3422_v2  ;;  %v3434_v16 = vld [vmem:[#allocation5 + $0x68] sm:$0xff]   ;;  %v3443_v21 = vld [vmem:[%s3933_s9 + $0x14] ss:$8 sps:$4 sm:$0xff]   ;;  %v3447_v23 = vld [vmem:[%s3933_s9 + $0x10] ss:$8 sps:$4 sm:$0xff]   ;;  %p3690_p6 = pnand %p3689_p4, %p3881_p12  ;;  %p3696_p13 = scmp.lt.s32.totalorder %s3694_s7, %s3688_s23 }
  0x5d   : > { %1115 = vmatprep.subr.bf16.mxu0 %v3766_v0  ;;  %3327 = vmatprep.subr.bf16.mxu1 %v3766_v0  ;;  %v3437_v19 = vld [vmem:[%s3933_s9] ss:$8 sps:$4 sm:$0xff]   ;;  %v3445_v22 = vld [vmem:[%s3933_s9 + $0x214] ss:$8 sps:$4 sm:$0xff]   ;;  %v3448_v24 = vld [vmem:[%s3933_s9 + $0x210] ss:$8 sps:$4 sm:$0xff]  }
  0x5e   : > { %v3440_v20 = vld [vmem:[%s3933_s9 + $0x200] ss:$8 sps:$4 sm:$0xff]   ;;  %v3449_v25 = vld [vmem:[%s3933_s9 + $0x24] ss:$8 sps:$4 sm:$0xff]   ;;  %v3455_v29 = vld [vmem:[%s3933_s9 + $0x34] ss:$8 sps:$4 sm:$0xff]   ;;  %p3691_p8 = pneg %p3690_p6  ;;  %p3697_p3 = por %p3696_p13, %p3695_p10 }
  0x5f   : > { %v3451_v26 = vld [vmem:[%s3933_s9 + $0x224] ss:$8 sps:$4 sm:$0xff]   ;;  %v3453_v27 = vld [vmem:[%s3933_s9 + $0x20] ss:$8 sps:$4 sm:$0xff]   ;;  %v3457_v30 = vld [vmem:[%s3933_s9 + $0x234] ss:$8 sps:$4 sm:$0xff]  }
  0x60   : > { %1116 = vmatpush1.bf16.msra.mxu0 %v3423_v3  ;;  %3343 = vmatpush1.bf16.msra.mxu1 %v3423_v3  ;;  %v3454_v28 = vld [vmem:[%s3933_s9 + $0x220] ss:$8 sps:$4 sm:$0xff]   ;;  %v3459_v31 = vld [vmem:[%s3933_s9 + $0x30] ss:$8 sps:$4 sm:$0xff]   ;;  %v3461_v33 = vld [vmem:[%s3933_s9 + $0x44] ss:$8 sps:$4 sm:$0xff]   ;;  %p3698_p7 = pnand %p3697_p3, %p3691_p8 }
  0x61   : > { %1117 = vmatprep.subr.bf16.mxu0 %v3766_v0  ;;  %3328 = vmatprep.subr.bf16.mxu1 %v3766_v0  ;;  %v3460_v32 = vld [vmem:[%s3933_s9 + $0x230] ss:$8 sps:$4 sm:$0xff]   ;;  %v3463_v34 = vld [vmem:[%s3933_s9 + $0x244] ss:$8 sps:$4 sm:$0xff]   ;;  %v3465_v35 = vld [vmem:[%s3933_s9 + $0x40] ss:$8 sps:$4 sm:$0xff]  }
  0x62   : > { %v3466_v36 = vld [vmem:[%s3933_s9 + $0x240] ss:$8 sps:$4 sm:$0xff]   ;;  %v3467_v37 = vld [vmem:[%s3933_s9 + $0x54] ss:$8 sps:$4 sm:$0xff]   ;;  %v3471_v39 = vld [vmem:[%s3933_s9 + $0x50] ss:$8 sps:$4 sm:$0xff]  }
  0x63   : > { %v3469_v38 = vld [vmem:[%s3933_s9 + $0x254] ss:$8 sps:$4 sm:$0xff]   ;;  %v3472_v40 = vld [vmem:[%s3933_s9 + $0x250] ss:$8 sps:$4 sm:$0xff]   ;;  %v3473_v41 = vld [vmem:[%s3933_s9 + $0x64] ss:$8 sps:$4 sm:$0xff]  }
  0x64   : > { %1118 = vmatpush1.bf16.msra.mxu0 %v3424_v4  ;;  %3344 = vmatpush1.bf16.msra.mxu1 %v3424_v4  ;;  %v3475_v42 = vld [vmem:[%s3933_s9 + $0x264] ss:$8 sps:$4 sm:$0xff]   ;;  %v3477_v43 = vld [vmem:[%s3933_s9 + $0x60] ss:$8 sps:$4 sm:$0xff]   ;;  %v3479_v45 = vld [vmem:[%s3933_s9 + $0x74] ss:$8 sps:$4 sm:$0xff]  }
  0x65   : > { %1119 = vmatprep.subr.bf16.mxu0 %v3766_v0  ;;  %3329 = vmatprep.subr.bf16.mxu1 %v3766_v0  ;;  %v3478_v44 = vld [vmem:[%s3933_s9 + $0x260] ss:$8 sps:$4 sm:$0xff]   ;;  %v3481_v46 = vld [vmem:[%s3933_s9 + $0x274] ss:$8 sps:$4 sm:$0xff]   ;;  %v3483_v47 = vld [vmem:[%s3933_s9 + $0x70] ss:$8 sps:$4 sm:$0xff]  }
  0x66   : > { %v3484_v48 = vld [vmem:[%s3933_s9 + $0x270] ss:$8 sps:$4 sm:$0xff]   ;;  %v3485_v49 = vld [vmem:[%s3933_s9 + $0x84] ss:$8 sps:$4 sm:$0xff]   ;;  %v3489_v51 = vld [vmem:[%s3933_s9 + $0x80] ss:$8 sps:$4 sm:$0xff]  }
  0x67   : > { %v3487_v50 = vld [vmem:[%s3933_s9 + $0x284] ss:$8 sps:$4 sm:$0xff]   ;;  %v3490_v52 = vld [vmem:[%s3933_s9 + $0x280] ss:$8 sps:$4 sm:$0xff]   ;;  %v3491_v53 = vld [vmem:[%s3933_s9 + $0x94] ss:$8 sps:$4 sm:$0xff]  }
  0x68   : > { %1120 = vmatpush1.bf16.msra.mxu0 %v3425_v5  ;;  %3345 = vmatpush1.bf16.msra.mxu1 %v3425_v5  ;;  %v3493_v54 = vld [vmem:[%s3933_s9 + $0x294] ss:$8 sps:$4 sm:$0xff]   ;;  %v3495_v55 = vld [vmem:[%s3933_s9 + $0x90] ss:$8 sps:$4 sm:$0xff]   ;;  %v3497_v57 = vld [vmem:[%s3933_s9 + $0xa4] ss:$8 sps:$4 sm:$0xff]  }
  0x69   : > { %1121 = vmatprep.subr.bf16.mxu0 %v3766_v0  ;;  %3330 = vmatprep.subr.bf16.mxu1 %v3766_v0  ;;  %v3496_v56 = vld [vmem:[%s3933_s9 + $0x290] ss:$8 sps:$4 sm:$0xff]   ;;  %v3499_v58 = vld [vmem:[%s3933_s9 + $0x2a4] ss:$8 sps:$4 sm:$0xff]   ;;  %v3501_v59 = vld [vmem:[%s3933_s9 + $0xa0] ss:$8 sps:$4 sm:$0xff]  }
  0x6a   : > { %v3502_v60 = vld [vmem:[%s3933_s9 + $0x2a0] ss:$8 sps:$4 sm:$0xff]   ;;  %v3503_v61 = vld [vmem:[%s3933_s9 + $0xb4] ss:$8 sps:$4 sm:$0xff]   ;;  %v3507_v63 = vld [vmem:[%s3933_s9 + $0xb0] ss:$8 sps:$4 sm:$0xff]  }
  0x6b   : > { %v3505_v62 = vld [vmem:[%s3933_s9 + $0x2b4] ss:$8 sps:$4 sm:$0xff]   ;;  %v3509_v1 = vld [vmem:[%s3933_s9 + $0xc4] ss:$8 sps:$4 sm:$0xff]   ;;  %v3513_v3 = vld [vmem:[%s3933_s9 + $0xc0] ss:$8 sps:$4 sm:$0xff]  }
  0x6c   : > { %1122 = vmatpush1.bf16.msra.mxu0 %v3426_v7  ;;  %3346 = vmatpush1.bf16.msra.mxu1 %v3426_v7  ;;  %v3511_v2 = vld [vmem:[%s3933_s9 + $0x2c4] ss:$8 sps:$4 sm:$0xff]   ;;  %v3514_v4 = vld [vmem:[%s3933_s9 + $0x2c0] ss:$8 sps:$4 sm:$0xff]   ;;  %v3515_v5 = vld [vmem:[%s3933_s9 + $0xd4] ss:$8 sps:$4 sm:$0xff]  }
  0x6d   : > { %1123 = vmatprep.subr.bf16.mxu0 %v3766_v0  ;;  %3331 = vmatprep.subr.bf16.mxu1 %v3766_v0  ;;  %v3517_v6 = vld [vmem:[%s3933_s9 + $0x2d4] ss:$8 sps:$4 sm:$0xff]   ;;  %v3519_v7 = vld [vmem:[%s3933_s9 + $0xd0] ss:$8 sps:$4 sm:$0xff]  }
  0x6e   : > { %v3520_v8 = vld [vmem:[%s3933_s9 + $0x2d0] ss:$8 sps:$4 sm:$0xff]  }
  0x70   : > { %1124 = vmatpush1.bf16.msra.mxu0 %v3427_v9  ;;  %3347 = vmatpush1.bf16.msra.mxu1 %v3427_v9  ;;  %v3521_v9 = vld [vmem:[%s3933_s9 + $0xe4] ss:$8 sps:$4 sm:$0xff]  }
  0x71   : > { %1125 = vmatprep.subr.bf16.mxu0 %v3766_v0  ;;  %3332 = vmatprep.subr.bf16.mxu1 %v3766_v0 }
  0x74   : > { %1126 = vmatpush1.bf16.msra.mxu0 %v3428_v10  ;;  %3348 = vmatpush1.bf16.msra.mxu1 %v3428_v10  ;;  %v3523_v10 = vld [vmem:[%s3933_s9 + $0x2e4] ss:$8 sps:$4 sm:$0xff]  }
  0x75   : > { %1127 = vmatprep.subr.bf16.mxu0 %v3766_v0  ;;  %3333 = vmatprep.subr.bf16.mxu1 %v3766_v0 }
  0x78   : > { %1128 = vmatpush1.bf16.msra.mxu0 %v3429_v11  ;;  %3349 = vmatpush1.bf16.msra.mxu1 %v3429_v11  ;;  %v3525_v11 = vld [vmem:[%s3933_s9 + $0xe0] ss:$8 sps:$4 sm:$0xff]  }
  0x79   : > { %1129 = vmatprep.subr.bf16.mxu0 %v3766_v0  ;;  %3334 = vmatprep.subr.bf16.mxu1 %v3766_v0 }
  0x7c   : > { %1130 = vmatpush1.bf16.msra.mxu0 %v3430_v12  ;;  %3350 = vmatpush1.bf16.msra.mxu1 %v3430_v12  ;;  %v3526_v12 = vld [vmem:[%s3933_s9 + $0x2e0] ss:$8 sps:$4 sm:$0xff]  }
  0x7d   : > { %1131 = vmatprep.subr.bf16.mxu0 %v3766_v0  ;;  %3335 = vmatprep.subr.bf16.mxu1 %v3766_v0 }
  0x80   : > { %1132 = vmatpush1.bf16.msra.mxu0 %v3431_v13  ;;  %3351 = vmatpush1.bf16.msra.mxu1 %v3431_v13  ;;  %v3527_v13 = vld [vmem:[%s3933_s9 + $0xf4] ss:$8 sps:$4 sm:$0xff]  }
  0x81   : > { %1133 = vmatprep.subr.bf16.mxu0 %v3766_v0  ;;  %3336 = vmatprep.subr.bf16.mxu1 %v3766_v0 }
  0x84   : > { %1134 = vmatpush1.bf16.msra.mxu0 %v3432_v14  ;;  %3352 = vmatpush1.bf16.msra.mxu1 %v3432_v14  ;;  %v3529_v14 = vld [vmem:[%s3933_s9 + $0x2f4] ss:$8 sps:$4 sm:$0xff]  }
  0x85   : > { %1135 = vmatprep.subr.bf16.mxu0 %v3766_v0  ;;  %3337 = vmatprep.subr.bf16.mxu1 %v3766_v0 }
  0x88   : > { %1136 = vmatpush1.bf16.msra.mxu0 %v3433_v15  ;;  %3353 = vmatpush1.bf16.msra.mxu1 %v3433_v15  ;;  %v3531_v15 = vld [vmem:[%s3933_s9 + $0xf0] ss:$8 sps:$4 sm:$0xff]  }
  0x89   : > { %1137 = vmatprep.subr.bf16.mxu0 %v3766_v0  ;;  %3338 = vmatprep.subr.bf16.mxu1 %v3766_v0 }
  0x8c   : > { %1138 = vmatpush1.bf16.msra.mxu0 %v3434_v16  ;;  %3354 = vmatpush1.bf16.msra.mxu1 %v3434_v16  ;;  %v3532_v16 = vld [vmem:[%s3933_s9 + $0x2f0] ss:$8 sps:$4 sm:$0xff]  }
  0x8d   : > { %1139 = vmatprep.subr.bf16.mxu0 %v3766_v0  ;;  %3339 = vmatprep.subr.bf16.mxu1 %v3766_v0 }
  0x90   : > { %1140 = vmatpush1.bf16.msra.mxu0 %v3435_v17  ;;  %3355 = vmatpush1.bf16.msra.mxu1 %v3435_v17  ;;  %v3533_v17 = vld [vmem:[%s3933_s9 + $0x104] ss:$8 sps:$4 sm:$0xff]  }
  0x91   : > { %1141 = vmatprep.subr.bf16.mxu0 %v3766_v0  ;;  %3340 = vmatprep.subr.bf16.mxu1 %v3766_v0  ;;  %v3508_v0 = vld [vmem:[%s3933_s9 + $0x2b0] ss:$8 sps:$4 sm:$0xff]  }
  0x94   : > { %1142 = vmatpush1.bf16.msra.mxu0 %v3436_v18  ;;  %3356 = vmatpush1.bf16.msra.mxu1 %v3436_v18  ;;  %v3535_v18 = vld [vmem:[%s3933_s9 + $0x304] ss:$8 sps:$4 sm:$0xff]  }
  0x97   : > { %1144 = vmatmul.mubr.bf16.vlgmr.msra.gmra.mrb[0].mxu0 %v3437_v19  ;;  %1400 = vmatmul.mubr.bf16.vlgmr.msra.gmra.mrb[0].mxu1 %v3440_v20  ;;  %v3537_v19 = vld [vmem:[%s3933_s9 + $0x100] ss:$8 sps:$4 sm:$0xff]  }
  0x98   : > { %1151 = vmatprep.mubr.bf16.mxu0 %v3443_v21  ;;  %1407 = vmatprep.mubr.bf16.mxu1 %v3445_v22  ;;  %v3538_v20 = vld [vmem:[%s3933_s9 + $0x300] ss:$8 sps:$4 sm:$0xff]   ;;  %v3539_v21 = vld [vmem:[%s3933_s9 + $0x114] ss:$8 sps:$4 sm:$0xff]  }
  0x99   : > { %v3541_v22 = vld [vmem:[%s3933_s9 + $0x314] ss:$8 sps:$4 sm:$0xff]  }
  0x9f   : > { %1152 = vmatmul.mubr.bf16.gmra.mrb[4].mxu0 %v3447_v23  ;;  %1408 = vmatmul.mubr.bf16.gmra.mrb[4].mxu1 %v3448_v24  ;;  %v3543_v23 = vld [vmem:[%s3933_s9 + $0x110] ss:$8 sps:$4 sm:$0xff]  }
  0xa0   : > { %1159 = vmatprep.mubr.bf16.mxu0 %v3449_v25  ;;  %1415 = vmatprep.mubr.bf16.mxu1 %v3451_v26  ;;  %v3544_v24 = vld [vmem:[%s3933_s9 + $0x310] ss:$8 sps:$4 sm:$0xff]   ;;  %v3545_v25 = vld [vmem:[%s3933_s9 + $0x124] ss:$8 sps:$4 sm:$0xff]  }
  0xa1   : > { %v3547_v26 = vld [vmem:[%s3933_s9 + $0x324] ss:$8 sps:$4 sm:$0xff]  }
  0xa7   : > { %1160 = vmatmul.mubr.bf16.gmra.mrb[8].mxu0 %v3453_v27  ;;  %1416 = vmatmul.mubr.bf16.gmra.mrb[8].mxu1 %v3454_v28  ;;  %v3549_v27 = vld [vmem:[%s3933_s9 + $0x120] ss:$8 sps:$4 sm:$0xff]  }
  0xa8   : > { %1167 = vmatprep.mubr.bf16.mxu0 %v3455_v29  ;;  %1423 = vmatprep.mubr.bf16.mxu1 %v3457_v30  ;;  %v3550_v28 = vld [vmem:[%s3933_s9 + $0x320] ss:$8 sps:$4 sm:$0xff]   ;;  %v3551_v29 = vld [vmem:[%s3933_s9 + $0x134] ss:$8 sps:$4 sm:$0xff]  }
  0xa9   : > { %v3553_v30 = vld [vmem:[%s3933_s9 + $0x334] ss:$8 sps:$4 sm:$0xff]  }
  0xaf   : > { %1168 = vmatmul.mubr.bf16.gmra.mrb[12].mxu0 %v3459_v31  ;;  %1424 = vmatmul.mubr.bf16.gmra.mrb[12].mxu1 %v3460_v32  ;;  %v3555_v31 = vld [vmem:[%s3933_s9 + $0x130] ss:$8 sps:$4 sm:$0xff]  }
  0xb0   : > { %1175 = vmatprep.mubr.bf16.mxu0 %v3461_v33  ;;  %1431 = vmatprep.mubr.bf16.mxu1 %v3463_v34  ;;  %v3556_v32 = vld [vmem:[%s3933_s9 + $0x330] ss:$8 sps:$4 sm:$0xff]   ;;  %v3557_v33 = vld [vmem:[%s3933_s9 + $0x144] ss:$8 sps:$4 sm:$0xff]  }
  0xb1   : > { %v3559_v34 = vld [vmem:[%s3933_s9 + $0x344] ss:$8 sps:$4 sm:$0xff]  }
  0xb7   : > { %1176 = vmatmul.mubr.bf16.gmra.mrb[16].mxu0 %v3465_v35  ;;  %1432 = vmatmul.mubr.bf16.gmra.mrb[16].mxu1 %v3466_v36  ;;  %v3561_v35 = vld [vmem:[%s3933_s9 + $0x140] ss:$8 sps:$4 sm:$0xff]  }
  0xb8   : > { %1183 = vmatprep.mubr.bf16.mxu0 %v3467_v37  ;;  %1439 = vmatprep.mubr.bf16.mxu1 %v3469_v38  ;;  %v3562_v36 = vld [vmem:[%s3933_s9 + $0x340] ss:$8 sps:$4 sm:$0xff]   ;;  %v3563_v37 = vld [vmem:[%s3933_s9 + $0x154] ss:$8 sps:$4 sm:$0xff]  }
  0xb9   : > { %v3565_v38 = vld [vmem:[%s3933_s9 + $0x354] ss:$8 sps:$4 sm:$0xff]  }
  0xbf   : > { %1184 = vmatmul.mubr.bf16.gmra.mrb[20].mxu0 %v3471_v39  ;;  %1440 = vmatmul.mubr.bf16.gmra.mrb[20].mxu1 %v3472_v40  ;;  %v3567_v39 = vld [vmem:[%s3933_s9 + $0x150] ss:$8 sps:$4 sm:$0xff]  }
  0xc0   : > { %1191 = vmatprep.mubr.bf16.mxu0 %v3473_v41  ;;  %1447 = vmatprep.mubr.bf16.mxu1 %v3475_v42  ;;  %v3568_v40 = vld [vmem:[%s3933_s9 + $0x350] ss:$8 sps:$4 sm:$0xff]   ;;  %v3569_v41 = vld [vmem:[%s3933_s9 + $0x164] ss:$8 sps:$4 sm:$0xff]  }
  0xc1   : > { %v3571_v42 = vld [vmem:[%s3933_s9 + $0x364] ss:$8 sps:$4 sm:$0xff]  }
  0xc7   : > { %1192 = vmatmul.mubr.bf16.gmra.mrb[24].mxu0 %v3477_v43  ;;  %1448 = vmatmul.mubr.bf16.gmra.mrb[24].mxu1 %v3478_v44  ;;  %v3573_v43 = vld [vmem:[%s3933_s9 + $0x160] ss:$8 sps:$4 sm:$0xff]  }
  0xc8   : > { %1199 = vmatprep.mubr.bf16.mxu0 %v3479_v45  ;;  %1455 = vmatprep.mubr.bf16.mxu1 %v3481_v46  ;;  %v3574_v44 = vld [vmem:[%s3933_s9 + $0x360] ss:$8 sps:$4 sm:$0xff]   ;;  %v3575_v45 = vld [vmem:[%s3933_s9 + $0x174] ss:$8 sps:$4 sm:$0xff]  }
  0xc9   : > { %v3577_v46 = vld [vmem:[%s3933_s9 + $0x374] ss:$8 sps:$4 sm:$0xff]  }
  0xcf   : > { %1200 = vmatmul.mubr.bf16.gmra.mrb[28].mxu0 %v3483_v47  ;;  %1456 = vmatmul.mubr.bf16.gmra.mrb[28].mxu1 %v3484_v48  ;;  %v3579_v47 = vld [vmem:[%s3933_s9 + $0x170] ss:$8 sps:$4 sm:$0xff]  }
  0xd0   : > { %1207 = vmatprep.mubr.bf16.mxu0 %v3485_v49  ;;  %1463 = vmatprep.mubr.bf16.mxu1 %v3487_v50  ;;  %v3580_v48 = vld [vmem:[%s3933_s9 + $0x370] ss:$8 sps:$4 sm:$0xff]   ;;  %v3581_v49 = vld [vmem:[%s3933_s9 + $0x184] ss:$8 sps:$4 sm:$0xff]  }
  0xd1   : > { %v3583_v50 = vld [vmem:[%s3933_s9 + $0x384] ss:$8 sps:$4 sm:$0xff]  }
  0xd7   : > { %1208 = vmatmul.mubr.bf16.gmra.mrb[32].mxu0 %v3489_v51  ;;  %1464 = vmatmul.mubr.bf16.gmra.mrb[32].mxu1 %v3490_v52  ;;  %v3585_v51 = vld [vmem:[%s3933_s9 + $0x180] ss:$8 sps:$4 sm:$0xff]  }
  0xd8   : > { %1215 = vmatprep.mubr.bf16.mxu0 %v3491_v53  ;;  %1471 = vmatprep.mubr.bf16.mxu1 %v3493_v54  ;;  %v3586_v52 = vld [vmem:[%s3933_s9 + $0x380] ss:$8 sps:$4 sm:$0xff]   ;;  %v3587_v53 = vld [vmem:[%s3933_s9 + $0x194] ss:$8 sps:$4 sm:$0xff]  }
  0xd9   : > { %v3589_v54 = vld [vmem:[%s3933_s9 + $0x394] ss:$8 sps:$4 sm:$0xff]  }
  0xdf   : > { %1216 = vmatmul.mubr.bf16.gmra.mrb[36].mxu0 %v3495_v55  ;;  %1472 = vmatmul.mubr.bf16.gmra.mrb[36].mxu1 %v3496_v56  ;;  %v3591_v55 = vld [vmem:[%s3933_s9 + $0x190] ss:$8 sps:$4 sm:$0xff]  }
  0xe0   : > { %1223 = vmatprep.mubr.bf16.mxu0 %v3497_v57  ;;  %1479 = vmatprep.mubr.bf16.mxu1 %v3499_v58  ;;  %v3592_v56 = vld [vmem:[%s3933_s9 + $0x390] ss:$8 sps:$4 sm:$0xff]   ;;  %v3593_v57 = vld [vmem:[%s3933_s9 + $0x1a4] ss:$8 sps:$4 sm:$0xff]  }
  0xe1   : > { %v3595_v58 = vld [vmem:[%s3933_s9 + $0x3a4] ss:$8 sps:$4 sm:$0xff]  }
  0xe7   : > { %1224 = vmatmul.mubr.bf16.gmra.mrb[40].mxu0 %v3501_v59  ;;  %1480 = vmatmul.mubr.bf16.gmra.mrb[40].mxu1 %v3502_v60  ;;  %v3597_v59 = vld [vmem:[%s3933_s9 + $0x1a0] ss:$8 sps:$4 sm:$0xff]  }
  0xe8   : > { %1231 = vmatprep.mubr.bf16.mxu0 %v3503_v61  ;;  %1487 = vmatprep.mubr.bf16.mxu1 %v3505_v62  ;;  %v3598_v60 = vld [vmem:[%s3933_s9 + $0x3a0] ss:$8 sps:$4 sm:$0xff]   ;;  %v3599_v61 = vld [vmem:[%s3933_s9 + $0x1b4] ss:$8 sps:$4 sm:$0xff]  }
  0xe9   : > { %v3601_v62 = vld [vmem:[%s3933_s9 + $0x3b4] ss:$8 sps:$4 sm:$0xff]  }
  0xef   : > { %1232 = vmatmul.mubr.bf16.gmra.mrb[44].mxu0 %v3507_v63  ;;  %1488 = vmatmul.mubr.bf16.gmra.mrb[44].mxu1 %v3508_v0  ;;  %v4088_v63 = vld [vmem:[%s4361_s2] ss:$0 sm:$0xff] }
  0xf0   : > { %1239 = vmatprep.mubr.bf16.mxu0 %v3509_v1  ;;  %1495 = vmatprep.mubr.bf16.mxu1 %v3511_v2 }
  0xf7   : > { %1240 = vmatmul.mubr.bf16.gmra.mrb[48].mxu0 %v3513_v3  ;;  %1496 = vmatmul.mubr.bf16.gmra.mrb[48].mxu1 %v3514_v4 }
  0xf8   : > { %1247 = vmatprep.mubr.bf16.mxu0 %v3515_v5  ;;  %1503 = vmatprep.mubr.bf16.mxu1 %v3517_v6  ;;  %v3603_v6 = vld [vmem:[%s3933_s9 + $0x1b0] ss:$8 sps:$4 sm:$0xff]  }
  0xff   : > { %1248 = vmatmul.mubr.bf16.gmra.mrb[52].mxu0 %v3519_v7  ;;  %1504 = vmatmul.mubr.bf16.gmra.mrb[52].mxu1 %v3520_v8  ;;  %v3604_v7 = vld [vmem:[%s3933_s9 + $0x3b0] ss:$8 sps:$4 sm:$0xff]  }
 0x100   : > { %1255 = vmatprep.mubr.bf16.mxu0 %v3521_v9  ;;  %1511 = vmatprep.mubr.bf16.mxu1 %v3523_v10  ;;  %v3605_v10 = vld [vmem:[%s3933_s9 + $0x1c4] ss:$8 sps:$4 sm:$0xff]  }
 0x107   : > { %1256 = vmatmul.mubr.bf16.gmra.mrb[56].mxu0 %v3525_v11  ;;  %1512 = vmatmul.mubr.bf16.gmra.mrb[56].mxu1 %v3526_v12  ;;  %v3607_v11 = vld [vmem:[%s3933_s9 + $0x3c4] ss:$8 sps:$4 sm:$0xff]  }
 0x108   : > { %1263 = vmatprep.mubr.bf16.mxu0 %v3527_v13  ;;  %1519 = vmatprep.mubr.bf16.mxu1 %v3529_v14 }
 0x10f   : > { %1264 = vmatmul.mubr.bf16.gmra.mrb[60].mxu0 %v3531_v15  ;;  %1520 = vmatmul.mubr.bf16.gmra.mrb[60].mxu1 %v3532_v16 }
 0x110   : > { %1271 = vmatprep.mubr.bf16.mxu0 %v3533_v17  ;;  %1527 = vmatprep.mubr.bf16.mxu1 %v3535_v18 }
 0x117   : > { %1272 = vmatmul.mubr.bf16.gmra.mrb[64].mxu0 %v3537_v19  ;;  %1528 = vmatmul.mubr.bf16.gmra.mrb[64].mxu1 %v3538_v20 }
 0x118   : > { %1279 = vmatprep.mubr.bf16.mxu0 %v3539_v21  ;;  %1535 = vmatprep.mubr.bf16.mxu1 %v3541_v22 }
 0x11f   : > { %1280 = vmatmul.mubr.bf16.gmra.mrb[68].mxu0 %v3543_v23  ;;  %1536 = vmatmul.mubr.bf16.gmra.mrb[68].mxu1 %v3544_v24 }
 0x120   : > { %1287 = vmatprep.mubr.bf16.mxu0 %v3545_v25  ;;  %1543 = vmatprep.mubr.bf16.mxu1 %v3547_v26 }
 0x127   : > { %1288 = vmatmul.mubr.bf16.gmra.mrb[72].mxu0 %v3549_v27  ;;  %1544 = vmatmul.mubr.bf16.gmra.mrb[72].mxu1 %v3550_v28  ;;  %v3609_v28 = vld [vmem:[%s3933_s9 + $0x1c0] ss:$8 sps:$4 sm:$0xff]  }
 0x128   : > { %1295 = vmatprep.mubr.bf16.mxu0 %v3551_v29  ;;  %1551 = vmatprep.mubr.bf16.mxu1 %v3553_v30  ;;  %v3610_v29 = vld [vmem:[%s3933_s9 + $0x3c0] ss:$8 sps:$4 sm:$0xff]  }
 0x12f   : > { %1296 = vmatmul.mubr.bf16.gmra.mrb[76].mxu0 %v3555_v31  ;;  %1552 = vmatmul.mubr.bf16.gmra.mrb[76].mxu1 %v3556_v32  ;;  %v3611_v32 = vld [vmem:[%s3933_s9 + $0x1d4] ss:$8 sps:$4 sm:$0xff]  }
 0x130   : > { %1303 = vmatprep.mubr.bf16.mxu0 %v3557_v33  ;;  %1559 = vmatprep.mubr.bf16.mxu1 %v3559_v34  ;;  %v3613_v33 = vld [vmem:[%s3933_s9 + $0x3d4] ss:$8 sps:$4 sm:$0xff]  }
 0x137   : > { %1304 = vmatmul.mubr.bf16.gmra.mrb[80].mxu0 %v3561_v35  ;;  %1560 = vmatmul.mubr.bf16.gmra.mrb[80].mxu1 %v3562_v36 }
 0x138   : > { %1311 = vmatprep.mubr.bf16.mxu0 %v3563_v37  ;;  %1567 = vmatprep.mubr.bf16.mxu1 %v3565_v38 }
 0x13f   : > { %1312 = vmatmul.mubr.bf16.gmra.mrb[84].mxu0 %v3567_v39  ;;  %1568 = vmatmul.mubr.bf16.gmra.mrb[84].mxu1 %v3568_v40 }
 0x140   : > { %1319 = vmatprep.mubr.bf16.mxu0 %v3569_v41  ;;  %1575 = vmatprep.mubr.bf16.mxu1 %v3571_v42 }
 0x147   : > { %1320 = vmatmul.mubr.bf16.gmra.mrb[88].mxu0 %v3573_v43  ;;  %1576 = vmatmul.mubr.bf16.gmra.mrb[88].mxu1 %v3574_v44 }
 0x148   : > { %1327 = vmatprep.mubr.bf16.mxu0 %v3575_v45  ;;  %1583 = vmatprep.mubr.bf16.mxu1 %v3577_v46 }
 0x14f   : > { %1328 = vmatmul.mubr.bf16.gmra.mrb[92].mxu0 %v3579_v47  ;;  %1584 = vmatmul.mubr.bf16.gmra.mrb[92].mxu1 %v3580_v48 }
 0x150   : > { %1335 = vmatprep.mubr.bf16.mxu0 %v3581_v49  ;;  %1591 = vmatprep.mubr.bf16.mxu1 %v3583_v50  ;;  %v3615_v50 = vld [vmem:[%s3933_s9 + $0x1d0] ss:$8 sps:$4 sm:$0xff]  }
 0x157   : > { %1336 = vmatmul.mubr.bf16.gmra.mrb[96].mxu0 %v3585_v51  ;;  %1592 = vmatmul.mubr.bf16.gmra.mrb[96].mxu1 %v3586_v52  ;;  %v3616_v51 = vld [vmem:[%s3933_s9 + $0x3d0] ss:$8 sps:$4 sm:$0xff]  }
 0x158   : > { %1343 = vmatprep.mubr.bf16.mxu0 %v3587_v53  ;;  %1599 = vmatprep.mubr.bf16.mxu1 %v3589_v54  ;;  %v3617_v54 = vld [vmem:[%s3933_s9 + $0x1e4] ss:$8 sps:$4 sm:$0xff]  }
 0x15f   : > { %1344 = vmatmul.mubr.bf16.gmra.mrb[100].mxu0 %v3591_v55  ;;  %1600 = vmatmul.mubr.bf16.gmra.mrb[100].mxu1 %v3592_v56  ;;  %v3619_v55 = vld [vmem:[%s3933_s9 + $0x3e4] ss:$8 sps:$4 sm:$0xff]  }
 0x160   : > { %1351 = vmatprep.mubr.bf16.mxu0 %v3593_v57  ;;  %1607 = vmatprep.mubr.bf16.mxu1 %v3595_v58 }
 0x167   : > { %1352 = vmatmul.mubr.bf16.gmra.mrb[104].mxu0 %v3597_v59  ;;  %1608 = vmatmul.mubr.bf16.gmra.mrb[104].mxu1 %v3598_v60 }
 0x168   : > { %1359 = vmatprep.mubr.bf16.mxu0 %v3599_v61  ;;  %1615 = vmatprep.mubr.bf16.mxu1 %v3601_v62 }
 0x16a   : > { %v1145_v0 = vpop.f32.mrb[0].mxu0  ;;  %v1401_v1 = vpop.f32.mrb[0].mxu1 }
 0x16b   : > { %v1146_v2 = vadd.f32 %v4088_v63, %v1145_v0  ;;  %v1402_v3 = vadd.f32 %v4088_v63, %v1401_v1  ;;  %v1147_v4 = vpop.f32.mrb[1].mxu0  ;;  %v1403_v5 = vpop.f32.mrb[1].mxu1 }
 0x16c   : > { %v1148_v8 = vpop.f32.mrb[2].mxu0  ;;  %v1404_v9 = vpop.f32.mrb[2].mxu1 }
 0x16d   : > { %v1149_v12 = vadd.f32 %v4088_v63, %v1148_v8  ;;  %v1405_v13 = vadd.f32 %v4088_v63, %v1404_v9  ;;  %v1150_v14 = vpop.f32.mrb[3].mxu0  ;;  %v1406_v15 = vpop.f32.mrb[3].mxu1  ;;  %v1656_v16 = vmax.f32 %v1146_v2, 0.0  ;;  %v1720_v17 = vmax.f32 %v1402_v3, 0.0  ;;  %v3621_v9 = vld [vmem:[%s3933_s9 + $0x1e0] ss:$8 sps:$4 sm:$0xff]  }
 0x16e   : > { %v3625_v14 = vld [vmem:[%s3933_s9 + $0x3f4] ss:$8 sps:$4 sm:$0xff]  }
 0x16f   : > { %v1657_v18 = vmax.f32 %v1149_v12, 0.0  ;;  %v1721_v19 = vmax.f32 %v1405_v13, 0.0  ;;  %1360 = vmatmul.mubr.bf16.gmra.mrb[108].mxu0 %v3603_v6  ;;  %1616 = vmatmul.mubr.bf16.gmra.mrb[108].mxu1 %v3604_v7  ;;  %v3623_v13 = vld [vmem:[%s3933_s9 + $0x1f4] ss:$8 sps:$4 sm:$0xff]  }
 0x170   : > { %1367 = vmatprep.mubr.bf16.mxu0 %v3605_v10  ;;  %1623 = vmatprep.mubr.bf16.mxu1 %v3607_v11  ;;  %v3622_v10 = vld [vmem:[%s3933_s9 + $0x3e0] ss:$8 sps:$4 sm:$0xff]  }
 0x171   : > { %v2945_v20 = vpack.c.bf16 %v1657_v18, %v1656_v16  ;;  %v3105_v21 = vpack.c.bf16 %v1721_v19, %v1720_v17 }
 0x172   : > { %v1153_v22 = vpop.f32.mrb[4].mxu0  ;;  %v1409_v23 = vpop.f32.mrb[4].mxu1 }
 0x173   : > { %2946 = vst [vmem:[%s4099_s25] sm:$0xff] %v2945_v20   ;;  %3293 = vst [vmem:[%s4099_s25 + $0x100] sm:$0xff] %v3105_v21   ;;  %v1154_v24 = vadd.f32 %v4088_v63, %v1153_v22  ;;  %v1410_v25 = vadd.f32 %v4088_v63, %v1409_v23  ;;  %v1155_v26 = vpop.f32.mrb[5].mxu0  ;;  %v1411_v27 = vpop.f32.mrb[5].mxu1 }
 0x174   : > { %v1156_v30 = vpop.f32.mrb[6].mxu0  ;;  %v1412_v31 = vpop.f32.mrb[6].mxu1 }
 0x175   : > { %v1157_v34 = vadd.f32 %v4088_v63, %v1156_v30  ;;  %v1413_v35 = vadd.f32 %v4088_v63, %v1412_v31  ;;  %v1158_v36 = vpop.f32.mrb[7].mxu0  ;;  %v1414_v37 = vpop.f32.mrb[7].mxu1  ;;  %v1658_v38 = vmax.f32 %v1154_v24, 0.0  ;;  %v1722_v39 = vmax.f32 %v1410_v25, 0.0  ;;  %v3627_v31 = vld [vmem:[%s3933_s9 + $0x1f0] ss:$8 sps:$4 sm:$0xff]  }
 0x177   : > { %v1659_v40 = vmax.f32 %v1157_v34, 0.0  ;;  %v1723_v41 = vmax.f32 %v1413_v35, 0.0  ;;  %1368 = vmatmul.mubr.bf16.gmra.mrb[112].mxu0 %v3609_v28  ;;  %1624 = vmatmul.mubr.bf16.gmra.mrb[112].mxu1 %v3610_v29 }
 0x178   : > { %1375 = vmatprep.mubr.bf16.mxu0 %v3611_v32  ;;  %1631 = vmatprep.mubr.bf16.mxu1 %v3613_v33  ;;  %v3628_v32 = vld [vmem:[%s3933_s9 + $0x3f0] ss:$8 sps:$4 sm:$0xff]  }
 0x179   : > { %v2950_v42 = vpack.c.bf16 %v1659_v40, %v1658_v38  ;;  %v3110_v43 = vpack.c.bf16 %v1723_v41, %v1722_v39 }
 0x17a   : > { %v1161_v44 = vpop.f32.mrb[8].mxu0  ;;  %v1417_v45 = vpop.f32.mrb[8].mxu1 }
 0x17b   : > { %3262 = vst [vmem:[%s4099_s25 + $0x8] sm:$0xff] %v2950_v42   ;;  %3294 = vst [vmem:[%s4099_s25 + $0x108] sm:$0xff] %v3110_v43   ;;  %v1162_v46 = vadd.f32 %v4088_v63, %v1161_v44  ;;  %v1418_v47 = vadd.f32 %v4088_v63, %v1417_v45  ;;  %v1163_v48 = vpop.f32.mrb[9].mxu0  ;;  %v1419_v49 = vpop.f32.mrb[9].mxu1 }
 0x17c   : > { %v1164_v52 = vpop.f32.mrb[10].mxu0  ;;  %v1420_v53 = vpop.f32.mrb[10].mxu1 }
 0x17d   : > { %v1165_v56 = vadd.f32 %v4088_v63, %v1164_v52  ;;  %v1421_v57 = vadd.f32 %v4088_v63, %v1420_v53  ;;  %v1166_v58 = vpop.f32.mrb[11].mxu0  ;;  %v1422_v59 = vpop.f32.mrb[11].mxu1  ;;  %v1660_v60 = vmax.f32 %v1162_v46, 0.0  ;;  %v1724_v61 = vmax.f32 %v1418_v47, 0.0 }
 0x17f   : > { %v1661_v62 = vmax.f32 %v1165_v56, 0.0  ;;  %v1725_v0 = vmax.f32 %v1421_v57, 0.0  ;;  %1376 = vmatmul.mubr.bf16.gmra.mrb[116].mxu0 %v3615_v50  ;;  %1632 = vmatmul.mubr.bf16.gmra.mrb[116].mxu1 %v3616_v51 }
 0x180   : > { %1383 = vmatprep.mubr.bf16.mxu0 %v3617_v54  ;;  %1639 = vmatprep.mubr.bf16.mxu1 %v3619_v55 }
 0x181   : > { %v2955_v1 = vpack.c.bf16 %v1661_v62, %v1660_v60  ;;  %v3115_v2 = vpack.c.bf16 %v1725_v0, %v1724_v61 }
 0x182   : > { %v1169_v3 = vpop.f32.mrb[12].mxu0  ;;  %v1425_v4 = vpop.f32.mrb[12].mxu1 }
 0x183   : > { %3263 = vst [vmem:[%s4099_s25 + $0x10] sm:$0xff] %v2955_v1   ;;  %3295 = vst [vmem:[%s4099_s25 + $0x110] sm:$0xff] %v3115_v2   ;;  %v1170_v5 = vadd.f32 %v4088_v63, %v1169_v3  ;;  %v1426_v6 = vadd.f32 %v4088_v63, %v1425_v4  ;;  %v1171_v7 = vpop.f32.mrb[13].mxu0  ;;  %v1427_v8 = vpop.f32.mrb[13].mxu1 }
 0x184   : > { %v1172_v11 = vpop.f32.mrb[14].mxu0  ;;  %v1428_v12 = vpop.f32.mrb[14].mxu1 }
 0x185   : > { %v1173_v15 = vadd.f32 %v4088_v63, %v1172_v11  ;;  %v1429_v16 = vadd.f32 %v4088_v63, %v1428_v12  ;;  %v1174_v17 = vpop.f32.mrb[15].mxu0  ;;  %v1430_v18 = vpop.f32.mrb[15].mxu1  ;;  %v1662_v19 = vmax.f32 %v1170_v5, 0.0  ;;  %v1726_v20 = vmax.f32 %v1426_v6, 0.0 }
 0x187   : > { %v1663_v21 = vmax.f32 %v1173_v15, 0.0  ;;  %v1727_v22 = vmax.f32 %v1429_v16, 0.0  ;;  %1384 = vmatmul.mubr.bf16.gmra.mrb[120].mxu0 %v3621_v9  ;;  %1640 = vmatmul.mubr.bf16.gmra.mrb[120].mxu1 %v3622_v10 }
 0x188   : > { %1391 = vmatprep.mubr.bf16.mxu0 %v3623_v13  ;;  %1647 = vmatprep.mubr.bf16.mxu1 %v3625_v14 }
 0x189   : > { %v2960_v23 = vpack.c.bf16 %v1663_v21, %v1662_v19  ;;  %v3120_v24 = vpack.c.bf16 %v1727_v22, %v1726_v20 }
 0x18a   : > { %v1177_v25 = vpop.f32.mrb[16].mxu0  ;;  %v1433_v26 = vpop.f32.mrb[16].mxu1 }
 0x18b   : > { %3264 = vst [vmem:[%s4099_s25 + $0x18] sm:$0xff] %v2960_v23   ;;  %3296 = vst [vmem:[%s4099_s25 + $0x118] sm:$0xff] %v3120_v24   ;;  %v1178_v27 = vadd.f32 %v4088_v63, %v1177_v25  ;;  %v1434_v28 = vadd.f32 %v4088_v63, %v1433_v26  ;;  %v1179_v29 = vpop.f32.mrb[17].mxu0  ;;  %v1435_v30 = vpop.f32.mrb[17].mxu1 }
 0x18c   : > { %v1180_v33 = vpop.f32.mrb[18].mxu0  ;;  %v1436_v34 = vpop.f32.mrb[18].mxu1 }
 0x18d   : > { %v1181_v35 = vadd.f32 %v4088_v63, %v1180_v33  ;;  %v1437_v36 = vadd.f32 %v4088_v63, %v1436_v34  ;;  %v1182_v37 = vpop.f32.mrb[19].mxu0  ;;  %v1438_v38 = vpop.f32.mrb[19].mxu1  ;;  %v1664_v39 = vmax.f32 %v1178_v27, 0.0  ;;  %v1728_v40 = vmax.f32 %v1434_v28, 0.0 }
 0x18f   : > { %v1665_v41 = vmax.f32 %v1181_v35, 0.0  ;;  %v1729_v42 = vmax.f32 %v1437_v36, 0.0  ;;  %1392 = vmatmul.mubr.bf16.gmra.mrb[124].mxu0 %v3627_v31  ;;  %1648 = vmatmul.mubr.bf16.gmra.mrb[124].mxu1 %v3628_v32 }
 0x191   : > { %v2965_v43 = vpack.c.bf16 %v1665_v41, %v1664_v39  ;;  %v3125_v44 = vpack.c.bf16 %v1729_v42, %v1728_v40 }
 0x192   : > { %v1185_v45 = vpop.f32.mrb[20].mxu0  ;;  %v1441_v46 = vpop.f32.mrb[20].mxu1 }
 0x193   : > { %3265 = vst [vmem:[%s4099_s25 + $0x20] sm:$0xff] %v2965_v43   ;;  %3297 = vst [vmem:[%s4099_s25 + $0x120] sm:$0xff] %v3125_v44   ;;  %v1186_v47 = vadd.f32 %v4088_v63, %v1185_v45  ;;  %v1442_v48 = vadd.f32 %v4088_v63, %v1441_v46  ;;  %v1187_v49 = vpop.f32.mrb[21].mxu0  ;;  %v1443_v50 = vpop.f32.mrb[21].mxu1 }
 0x194   : > { %v1188_v51 = vpop.f32.mrb[22].mxu0  ;;  %v1444_v52 = vpop.f32.mrb[22].mxu1 }
 0x195   : > { %v1189_v53 = vadd.f32 %v4088_v63, %v1188_v51  ;;  %v1445_v54 = vadd.f32 %v4088_v63, %v1444_v52  ;;  %v1190_v55 = vpop.f32.mrb[23].mxu0  ;;  %v1446_v56 = vpop.f32.mrb[23].mxu1  ;;  %v1666_v57 = vmax.f32 %v1186_v47, 0.0  ;;  %v1730_v58 = vmax.f32 %v1442_v48, 0.0 }
 0x197   : > { %v1667_v59 = vmax.f32 %v1189_v53, 0.0  ;;  %v1731_v60 = vmax.f32 %v1445_v54, 0.0 }
 0x199   : > { %v2970_v61 = vpack.c.bf16 %v1667_v59, %v1666_v57  ;;  %v3130_v62 = vpack.c.bf16 %v1731_v60, %v1730_v58 }
 0x19a   : > { %v1193_v0 = vpop.f32.mrb[24].mxu0  ;;  %v1449_v1 = vpop.f32.mrb[24].mxu1 }
 0x19b   : > { %3266 = vst [vmem:[%s4099_s25 + $0x28] sm:$0xff] %v2970_v61   ;;  %3298 = vst [vmem:[%s4099_s25 + $0x128] sm:$0xff] %v3130_v62   ;;  %v1194_v2 = vadd.f32 %v4088_v63, %v1193_v0  ;;  %v1450_v3 = vadd.f32 %v4088_v63, %v1449_v1  ;;  %v1195_v4 = vpop.f32.mrb[25].mxu0  ;;  %v1451_v5 = vpop.f32.mrb[25].mxu1 }
 0x19c   : > { %v1196_v6 = vpop.f32.mrb[26].mxu0  ;;  %v1452_v7 = vpop.f32.mrb[26].mxu1 }
 0x19d   : > { %v1197_v8 = vadd.f32 %v4088_v63, %v1196_v6  ;;  %v1453_v9 = vadd.f32 %v4088_v63, %v1452_v7  ;;  %v1198_v10 = vpop.f32.mrb[27].mxu0  ;;  %v1454_v11 = vpop.f32.mrb[27].mxu1  ;;  %v1668_v12 = vmax.f32 %v1194_v2, 0.0  ;;  %v1732_v13 = vmax.f32 %v1450_v3, 0.0 }
 0x19f   : > { %v1669_v14 = vmax.f32 %v1197_v8, 0.0  ;;  %v1733_v15 = vmax.f32 %v1453_v9, 0.0 }
 0x1a1   : > { %v2975_v16 = vpack.c.bf16 %v1669_v14, %v1668_v12  ;;  %v3135_v17 = vpack.c.bf16 %v1733_v15, %v1732_v13 }
 0x1a2   : > { %v1201_v18 = vpop.f32.mrb[28].mxu0  ;;  %v1457_v19 = vpop.f32.mrb[28].mxu1 }
 0x1a3   : > { %3267 = vst [vmem:[%s4099_s25 + $0x30] sm:$0xff] %v2975_v16   ;;  %3299 = vst [vmem:[%s4099_s25 + $0x130] sm:$0xff] %v3135_v17   ;;  %v1202_v20 = vadd.f32 %v4088_v63, %v1201_v18  ;;  %v1458_v21 = vadd.f32 %v4088_v63, %v1457_v19  ;;  %v1203_v22 = vpop.f32.mrb[29].mxu0  ;;  %v1459_v23 = vpop.f32.mrb[29].mxu1 }
 0x1a4   : > { %v1204_v24 = vpop.f32.mrb[30].mxu0  ;;  %v1460_v25 = vpop.f32.mrb[30].mxu1 }
 0x1a5   : > { %v1205_v26 = vadd.f32 %v4088_v63, %v1204_v24  ;;  %v1461_v27 = vadd.f32 %v4088_v63, %v1460_v25  ;;  %v1206_v28 = vpop.f32.mrb[31].mxu0  ;;  %v1462_v29 = vpop.f32.mrb[31].mxu1  ;;  %v1670_v30 = vmax.f32 %v1202_v20, 0.0  ;;  %v1734_v31 = vmax.f32 %v1458_v21, 0.0 }
 0x1a7   : > { %v1671_v32 = vmax.f32 %v1205_v26, 0.0  ;;  %v1735_v33 = vmax.f32 %v1461_v27, 0.0 }
 0x1a9   : > { %v2980_v34 = vpack.c.bf16 %v1671_v32, %v1670_v30  ;;  %v3140_v35 = vpack.c.bf16 %v1735_v33, %v1734_v31 }
 0x1aa   : > { %v1209_v36 = vpop.f32.mrb[32].mxu0  ;;  %v1465_v37 = vpop.f32.mrb[32].mxu1 }
 0x1ab   : > { %3268 = vst [vmem:[%s4099_s25 + $0x38] sm:$0xff] %v2980_v34   ;;  %3300 = vst [vmem:[%s4099_s25 + $0x138] sm:$0xff] %v3140_v35   ;;  %v1210_v38 = vadd.f32 %v4088_v63, %v1209_v36  ;;  %v1466_v39 = vadd.f32 %v4088_v63, %v1465_v37  ;;  %v1211_v40 = vpop.f32.mrb[33].mxu0  ;;  %v1467_v41 = vpop.f32.mrb[33].mxu1 }
 0x1ac   : > { %v1212_v42 = vpop.f32.mrb[34].mxu0  ;;  %v1468_v43 = vpop.f32.mrb[34].mxu1 }
 0x1ad   : > { %v1213_v44 = vadd.f32 %v4088_v63, %v1212_v42  ;;  %v1469_v45 = vadd.f32 %v4088_v63, %v1468_v43  ;;  %v1214_v46 = vpop.f32.mrb[35].mxu0  ;;  %v1470_v47 = vpop.f32.mrb[35].mxu1  ;;  %v1672_v48 = vmax.f32 %v1210_v38, 0.0  ;;  %v1736_v49 = vmax.f32 %v1466_v39, 0.0 }
 0x1af   : > { %v1673_v50 = vmax.f32 %v1213_v44, 0.0  ;;  %v1737_v51 = vmax.f32 %v1469_v45, 0.0 }
 0x1b1   : > { %v2985_v52 = vpack.c.bf16 %v1673_v50, %v1672_v48  ;;  %v3145_v53 = vpack.c.bf16 %v1737_v51, %v1736_v49 }
 0x1b2   : > { %v1217_v54 = vpop.f32.mrb[36].mxu0  ;;  %v1473_v55 = vpop.f32.mrb[36].mxu1 }
 0x1b3   : > { %3269 = vst [vmem:[%s4099_s25 + $0x40] sm:$0xff] %v2985_v52   ;;  %3301 = vst [vmem:[%s4099_s25 + $0x140] sm:$0xff] %v3145_v53   ;;  %v1218_v56 = vadd.f32 %v4088_v63, %v1217_v54  ;;  %v1474_v57 = vadd.f32 %v4088_v63, %v1473_v55  ;;  %v1219_v58 = vpop.f32.mrb[37].mxu0  ;;  %v1475_v59 = vpop.f32.mrb[37].mxu1 }
 0x1b4   : > { %v1220_v60 = vpop.f32.mrb[38].mxu0  ;;  %v1476_v61 = vpop.f32.mrb[38].mxu1 }
 0x1b5   : > { %v1221_v62 = vadd.f32 %v4088_v63, %v1220_v60  ;;  %v1477_v0 = vadd.f32 %v4088_v63, %v1476_v61  ;;  %v1222_v1 = vpop.f32.mrb[39].mxu0  ;;  %v1478_v2 = vpop.f32.mrb[39].mxu1  ;;  %v1674_v3 = vmax.f32 %v1218_v56, 0.0  ;;  %v1738_v4 = vmax.f32 %v1474_v57, 0.0 }
 0x1b7   : > { %v1675_v5 = vmax.f32 %v1221_v62, 0.0  ;;  %v1739_v6 = vmax.f32 %v1477_v0, 0.0 }
 0x1b9   : > { %v2990_v7 = vpack.c.bf16 %v1675_v5, %v1674_v3  ;;  %v3150_v8 = vpack.c.bf16 %v1739_v6, %v1738_v4 }
 0x1ba   : > { %v1225_v9 = vpop.f32.mrb[40].mxu0  ;;  %v1481_v10 = vpop.f32.mrb[40].mxu1 }
 0x1bb   : > { %3270 = vst [vmem:[%s4099_s25 + $0x48] sm:$0xff] %v2990_v7   ;;  %3302 = vst [vmem:[%s4099_s25 + $0x148] sm:$0xff] %v3150_v8   ;;  %v1226_v11 = vadd.f32 %v4088_v63, %v1225_v9  ;;  %v1482_v12 = vadd.f32 %v4088_v63, %v1481_v10  ;;  %v1227_v13 = vpop.f32.mrb[41].mxu0  ;;  %v1483_v14 = vpop.f32.mrb[41].mxu1 }
 0x1bc   : > { %v1228_v15 = vpop.f32.mrb[42].mxu0  ;;  %v1484_v16 = vpop.f32.mrb[42].mxu1 }
 0x1bd   : > { %v1229_v17 = vadd.f32 %v4088_v63, %v1228_v15  ;;  %v1485_v18 = vadd.f32 %v4088_v63, %v1484_v16  ;;  %v1230_v19 = vpop.f32.mrb[43].mxu0  ;;  %v1486_v20 = vpop.f32.mrb[43].mxu1  ;;  %v1676_v21 = vmax.f32 %v1226_v11, 0.0  ;;  %v1740_v22 = vmax.f32 %v1482_v12, 0.0 }
 0x1bf   : > { %v1677_v23 = vmax.f32 %v1229_v17, 0.0  ;;  %v1741_v24 = vmax.f32 %v1485_v18, 0.0 }
 0x1c1   : > { %v2995_v25 = vpack.c.bf16 %v1677_v23, %v1676_v21  ;;  %v3155_v26 = vpack.c.bf16 %v1741_v24, %v1740_v22 }
 0x1c2   : > { %v1233_v27 = vpop.f32.mrb[44].mxu0  ;;  %v1489_v28 = vpop.f32.mrb[44].mxu1 }
 0x1c3   : > { %3271 = vst [vmem:[%s4099_s25 + $0x50] sm:$0xff] %v2995_v25   ;;  %3303 = vst [vmem:[%s4099_s25 + $0x150] sm:$0xff] %v3155_v26   ;;  %v1234_v29 = vadd.f32 %v4088_v63, %v1233_v27  ;;  %v1490_v30 = vadd.f32 %v4088_v63, %v1489_v28  ;;  %v1235_v31 = vpop.f32.mrb[45].mxu0  ;;  %v1491_v32 = vpop.f32.mrb[45].mxu1 }
 0x1c4   : > { %v1236_v33 = vpop.f32.mrb[46].mxu0  ;;  %v1492_v34 = vpop.f32.mrb[46].mxu1 }
 0x1c5   : > { %v1237_v35 = vadd.f32 %v4088_v63, %v1236_v33  ;;  %v1493_v36 = vadd.f32 %v4088_v63, %v1492_v34  ;;  %v1238_v37 = vpop.f32.mrb[47].mxu0  ;;  %v1494_v38 = vpop.f32.mrb[47].mxu1  ;;  %v1678_v39 = vmax.f32 %v1234_v29, 0.0  ;;  %v1742_v40 = vmax.f32 %v1490_v30, 0.0 }
 0x1c7   : > { %v1679_v41 = vmax.f32 %v1237_v35, 0.0  ;;  %v1743_v42 = vmax.f32 %v1493_v36, 0.0 }
 0x1c9   : > { %v3000_v43 = vpack.c.bf16 %v1679_v41, %v1678_v39  ;;  %v3160_v44 = vpack.c.bf16 %v1743_v42, %v1742_v40 }
 0x1ca   : > { %v1241_v45 = vpop.f32.mrb[48].mxu0  ;;  %v1497_v46 = vpop.f32.mrb[48].mxu1 }
 0x1cb   : > { %3272 = vst [vmem:[%s4099_s25 + $0x58] sm:$0xff] %v3000_v43   ;;  %3304 = vst [vmem:[%s4099_s25 + $0x158] sm:$0xff] %v3160_v44   ;;  %v1242_v47 = vadd.f32 %v4088_v63, %v1241_v45  ;;  %v1498_v48 = vadd.f32 %v4088_v63, %v1497_v46  ;;  %v1243_v49 = vpop.f32.mrb[49].mxu0  ;;  %v1499_v50 = vpop.f32.mrb[49].mxu1 }
 0x1cc   : > { %v1244_v51 = vpop.f32.mrb[50].mxu0  ;;  %v1500_v52 = vpop.f32.mrb[50].mxu1 }
 0x1cd   : > { %v1245_v53 = vadd.f32 %v4088_v63, %v1244_v51  ;;  %v1501_v54 = vadd.f32 %v4088_v63, %v1500_v52  ;;  %v1246_v55 = vpop.f32.mrb[51].mxu0  ;;  %v1502_v56 = vpop.f32.mrb[51].mxu1  ;;  %v1680_v57 = vmax.f32 %v1242_v47, 0.0  ;;  %v1744_v58 = vmax.f32 %v1498_v48, 0.0 }
 0x1cf   : > { %v1681_v59 = vmax.f32 %v1245_v53, 0.0  ;;  %v1745_v60 = vmax.f32 %v1501_v54, 0.0 }
 0x1d1   : > { %v3005_v61 = vpack.c.bf16 %v1681_v59, %v1680_v57  ;;  %v3165_v62 = vpack.c.bf16 %v1745_v60, %v1744_v58 }
 0x1d2   : > { %v1249_v0 = vpop.f32.mrb[52].mxu0  ;;  %v1505_v1 = vpop.f32.mrb[52].mxu1 }
 0x1d3   : > { %3273 = vst [vmem:[%s4099_s25 + $0x60] sm:$0xff] %v3005_v61   ;;  %3305 = vst [vmem:[%s4099_s25 + $0x160] sm:$0xff] %v3165_v62   ;;  %v1250_v2 = vadd.f32 %v4088_v63, %v1249_v0  ;;  %v1506_v3 = vadd.f32 %v4088_v63, %v1505_v1  ;;  %v1251_v4 = vpop.f32.mrb[53].mxu0  ;;  %v1507_v5 = vpop.f32.mrb[53].mxu1 }
 0x1d4   : > { %v1252_v6 = vpop.f32.mrb[54].mxu0  ;;  %v1508_v7 = vpop.f32.mrb[54].mxu1 }
 0x1d5   : > { %v1253_v8 = vadd.f32 %v4088_v63, %v1252_v6  ;;  %v1509_v9 = vadd.f32 %v4088_v63, %v1508_v7  ;;  %v1254_v10 = vpop.f32.mrb[55].mxu0  ;;  %v1510_v11 = vpop.f32.mrb[55].mxu1  ;;  %v1682_v12 = vmax.f32 %v1250_v2, 0.0  ;;  %v1746_v13 = vmax.f32 %v1506_v3, 0.0 }
 0x1d7   : > { %v1683_v14 = vmax.f32 %v1253_v8, 0.0  ;;  %v1747_v15 = vmax.f32 %v1509_v9, 0.0 }
 0x1d9   : > { %v3010_v16 = vpack.c.bf16 %v1683_v14, %v1682_v12  ;;  %v3170_v17 = vpack.c.bf16 %v1747_v15, %v1746_v13 }
 0x1da   : > { %v1257_v18 = vpop.f32.mrb[56].mxu0  ;;  %v1513_v19 = vpop.f32.mrb[56].mxu1 }
 0x1db   : > { %3274 = vst [vmem:[%s4099_s25 + $0x68] sm:$0xff] %v3010_v16   ;;  %3306 = vst [vmem:[%s4099_s25 + $0x168] sm:$0xff] %v3170_v17   ;;  %v1258_v20 = vadd.f32 %v4088_v63, %v1257_v18  ;;  %v1514_v21 = vadd.f32 %v4088_v63, %v1513_v19  ;;  %v1259_v22 = vpop.f32.mrb[57].mxu0  ;;  %v1515_v23 = vpop.f32.mrb[57].mxu1 }
 0x1dc   : > { %v1260_v24 = vpop.f32.mrb[58].mxu0  ;;  %v1516_v25 = vpop.f32.mrb[58].mxu1 }
 0x1dd   : > { %v1261_v26 = vadd.f32 %v4088_v63, %v1260_v24  ;;  %v1517_v27 = vadd.f32 %v4088_v63, %v1516_v25  ;;  %v1262_v28 = vpop.f32.mrb[59].mxu0  ;;  %v1518_v29 = vpop.f32.mrb[59].mxu1  ;;  %v1684_v30 = vmax.f32 %v1258_v20, 0.0  ;;  %v1748_v31 = vmax.f32 %v1514_v21, 0.0 }
 0x1df   : > { %v1685_v32 = vmax.f32 %v1261_v26, 0.0  ;;  %v1749_v33 = vmax.f32 %v1517_v27, 0.0 }
 0x1e1   : > { %v3015_v34 = vpack.c.bf16 %v1685_v32, %v1684_v30  ;;  %v3175_v35 = vpack.c.bf16 %v1749_v33, %v1748_v31 }
 0x1e2   : > { %v1265_v36 = vpop.f32.mrb[60].mxu0  ;;  %v1521_v37 = vpop.f32.mrb[60].mxu1 }
 0x1e3   : > { %3275 = vst [vmem:[%s4099_s25 + $0x70] sm:$0xff] %v3015_v34   ;;  %3307 = vst [vmem:[%s4099_s25 + $0x170] sm:$0xff] %v3175_v35   ;;  %v1266_v38 = vadd.f32 %v4088_v63, %v1265_v36  ;;  %v1522_v39 = vadd.f32 %v4088_v63, %v1521_v37  ;;  %v1267_v40 = vpop.f32.mrb[61].mxu0  ;;  %v1523_v41 = vpop.f32.mrb[61].mxu1 }
 0x1e4   : > { %v1268_v42 = vpop.f32.mrb[62].mxu0  ;;  %v1524_v43 = vpop.f32.mrb[62].mxu1 }
 0x1e5   : > { %v1269_v44 = vadd.f32 %v4088_v63, %v1268_v42  ;;  %v1525_v45 = vadd.f32 %v4088_v63, %v1524_v43  ;;  %v1270_v46 = vpop.f32.mrb[63].mxu0  ;;  %v1526_v47 = vpop.f32.mrb[63].mxu1  ;;  %v1686_v48 = vmax.f32 %v1266_v38, 0.0  ;;  %v1750_v49 = vmax.f32 %v1522_v39, 0.0 }
 0x1e7   : > { %v1687_v50 = vmax.f32 %v1269_v44, 0.0  ;;  %v1751_v51 = vmax.f32 %v1525_v45, 0.0 }
 0x1e9   : > { %v3020_v52 = vpack.c.bf16 %v1687_v50, %v1686_v48  ;;  %v3180_v53 = vpack.c.bf16 %v1751_v51, %v1750_v49 }
 0x1ea   : > { %v1273_v54 = vpop.f32.mrb[64].mxu0  ;;  %v1529_v55 = vpop.f32.mrb[64].mxu1 }
 0x1eb   : > { %3276 = vst [vmem:[%s4099_s25 + $0x78] sm:$0xff] %v3020_v52   ;;  %3308 = vst [vmem:[%s4099_s25 + $0x178] sm:$0xff] %v3180_v53   ;;  %v1274_v56 = vadd.f32 %v4088_v63, %v1273_v54  ;;  %v1530_v57 = vadd.f32 %v4088_v63, %v1529_v55  ;;  %v1275_v58 = vpop.f32.mrb[65].mxu0  ;;  %v1531_v59 = vpop.f32.mrb[65].mxu1 }
 0x1ec   : > { %v1276_v60 = vpop.f32.mrb[66].mxu0  ;;  %v1532_v61 = vpop.f32.mrb[66].mxu1 }
 0x1ed   : > { %v1277_v62 = vadd.f32 %v4088_v63, %v1276_v60  ;;  %v1533_v0 = vadd.f32 %v4088_v63, %v1532_v61  ;;  %v1278_v1 = vpop.f32.mrb[67].mxu0  ;;  %v1534_v2 = vpop.f32.mrb[67].mxu1  ;;  %v1688_v3 = vmax.f32 %v1274_v56, 0.0  ;;  %v1752_v4 = vmax.f32 %v1530_v57, 0.0 }
 0x1ef   : > { %v1689_v5 = vmax.f32 %v1277_v62, 0.0  ;;  %v1753_v6 = vmax.f32 %v1533_v0, 0.0 }
 0x1f1   : > { %v3025_v7 = vpack.c.bf16 %v1689_v5, %v1688_v3  ;;  %v3185_v8 = vpack.c.bf16 %v1753_v6, %v1752_v4 }
 0x1f2   : > { %v1281_v9 = vpop.f32.mrb[68].mxu0  ;;  %v1537_v10 = vpop.f32.mrb[68].mxu1 }
 0x1f3   : > { %3277 = vst [vmem:[%s4099_s25 + $0x80] sm:$0xff] %v3025_v7   ;;  %3309 = vst [vmem:[%s4099_s25 + $0x180] sm:$0xff] %v3185_v8   ;;  %v1282_v11 = vadd.f32 %v4088_v63, %v1281_v9  ;;  %v1538_v12 = vadd.f32 %v4088_v63, %v1537_v10  ;;  %v1283_v13 = vpop.f32.mrb[69].mxu0  ;;  %v1539_v14 = vpop.f32.mrb[69].mxu1 }
 0x1f4   : > { %v1284_v15 = vpop.f32.mrb[70].mxu0  ;;  %v1540_v16 = vpop.f32.mrb[70].mxu1 }
 0x1f5   : > { %v1285_v17 = vadd.f32 %v4088_v63, %v1284_v15  ;;  %v1541_v18 = vadd.f32 %v4088_v63, %v1540_v16  ;;  %v1286_v19 = vpop.f32.mrb[71].mxu0  ;;  %v1542_v20 = vpop.f32.mrb[71].mxu1  ;;  %v1690_v21 = vmax.f32 %v1282_v11, 0.0  ;;  %v1754_v22 = vmax.f32 %v1538_v12, 0.0 }
 0x1f7   : > { %v1691_v23 = vmax.f32 %v1285_v17, 0.0  ;;  %v1755_v24 = vmax.f32 %v1541_v18, 0.0 }
 0x1f9   : > { %v3030_v25 = vpack.c.bf16 %v1691_v23, %v1690_v21  ;;  %v3190_v26 = vpack.c.bf16 %v1755_v24, %v1754_v22 }
 0x1fa   : > { %v1289_v27 = vpop.f32.mrb[72].mxu0  ;;  %v1545_v28 = vpop.f32.mrb[72].mxu1 }
 0x1fb   : > { %3278 = vst [vmem:[%s4099_s25 + $0x88] sm:$0xff] %v3030_v25   ;;  %3310 = vst [vmem:[%s4099_s25 + $0x188] sm:$0xff] %v3190_v26   ;;  %v1290_v29 = vadd.f32 %v4088_v63, %v1289_v27  ;;  %v1546_v30 = vadd.f32 %v4088_v63, %v1545_v28  ;;  %v1291_v31 = vpop.f32.mrb[73].mxu0  ;;  %v1547_v32 = vpop.f32.mrb[73].mxu1 }
 0x1fc   : > { %v1292_v33 = vpop.f32.mrb[74].mxu0  ;;  %v1548_v34 = vpop.f32.mrb[74].mxu1 }
 0x1fd   : > { %v1293_v35 = vadd.f32 %v4088_v63, %v1292_v33  ;;  %v1549_v36 = vadd.f32 %v4088_v63, %v1548_v34  ;;  %v1294_v37 = vpop.f32.mrb[75].mxu0  ;;  %v1550_v38 = vpop.f32.mrb[75].mxu1  ;;  %v1692_v39 = vmax.f32 %v1290_v29, 0.0  ;;  %v1756_v40 = vmax.f32 %v1546_v30, 0.0 }
 0x1ff   : > { %v1693_v41 = vmax.f32 %v1293_v35, 0.0  ;;  %v1757_v42 = vmax.f32 %v1549_v36, 0.0 }
 0x201   : > { %v3035_v43 = vpack.c.bf16 %v1693_v41, %v1692_v39  ;;  %v3195_v44 = vpack.c.bf16 %v1757_v42, %v1756_v40 }
 0x202   : > { %v1297_v45 = vpop.f32.mrb[76].mxu0  ;;  %v1553_v46 = vpop.f32.mrb[76].mxu1 }
 0x203   : > { %3279 = vst [vmem:[%s4099_s25 + $0x90] sm:$0xff] %v3035_v43   ;;  %3311 = vst [vmem:[%s4099_s25 + $0x190] sm:$0xff] %v3195_v44   ;;  %v1298_v47 = vadd.f32 %v4088_v63, %v1297_v45  ;;  %v1554_v48 = vadd.f32 %v4088_v63, %v1553_v46  ;;  %v1299_v49 = vpop.f32.mrb[77].mxu0  ;;  %v1555_v50 = vpop.f32.mrb[77].mxu1 }
 0x204   : > { %v1300_v51 = vpop.f32.mrb[78].mxu0  ;;  %v1556_v52 = vpop.f32.mrb[78].mxu1 }
 0x205   : > { %v1301_v53 = vadd.f32 %v4088_v63, %v1300_v51  ;;  %v1557_v54 = vadd.f32 %v4088_v63, %v1556_v52  ;;  %v1302_v55 = vpop.f32.mrb[79].mxu0  ;;  %v1558_v56 = vpop.f32.mrb[79].mxu1  ;;  %v1694_v57 = vmax.f32 %v1298_v47, 0.0  ;;  %v1758_v58 = vmax.f32 %v1554_v48, 0.0 }
 0x207   : > { %v1695_v59 = vmax.f32 %v1301_v53, 0.0  ;;  %v1759_v60 = vmax.f32 %v1557_v54, 0.0 }
 0x209   : > { %v3040_v61 = vpack.c.bf16 %v1695_v59, %v1694_v57  ;;  %v3200_v62 = vpack.c.bf16 %v1759_v60, %v1758_v58 }
 0x20a   : > { %v1305_v0 = vpop.f32.mrb[80].mxu0  ;;  %v1561_v1 = vpop.f32.mrb[80].mxu1 }
 0x20b   : > { %3280 = vst [vmem:[%s4099_s25 + $0x98] sm:$0xff] %v3040_v61   ;;  %3312 = vst [vmem:[%s4099_s25 + $0x198] sm:$0xff] %v3200_v62   ;;  %v1306_v2 = vadd.f32 %v4088_v63, %v1305_v0  ;;  %v1562_v3 = vadd.f32 %v4088_v63, %v1561_v1  ;;  %v1307_v4 = vpop.f32.mrb[81].mxu0  ;;  %v1563_v5 = vpop.f32.mrb[81].mxu1 }
 0x20c   : > { %v1308_v6 = vpop.f32.mrb[82].mxu0  ;;  %v1564_v7 = vpop.f32.mrb[82].mxu1 }
 0x20d   : > { %v1309_v8 = vadd.f32 %v4088_v63, %v1308_v6  ;;  %v1565_v9 = vadd.f32 %v4088_v63, %v1564_v7  ;;  %v1310_v10 = vpop.f32.mrb[83].mxu0  ;;  %v1566_v11 = vpop.f32.mrb[83].mxu1  ;;  %v1696_v12 = vmax.f32 %v1306_v2, 0.0  ;;  %v1760_v13 = vmax.f32 %v1562_v3, 0.0 }
 0x20e   : > { %v4258_v11 = vld [vmem:[%s4361_s2] ss:$0 sm:$0xff] }
 0x20f   : > { %v1697_v14 = vmax.f32 %v1309_v8, 0.0  ;;  %v1761_v15 = vmax.f32 %v1565_v9, 0.0 }
 0x211   : > { %v3045_v16 = vpack.c.bf16 %v1697_v14, %v1696_v12  ;;  %v3205_v17 = vpack.c.bf16 %v1761_v15, %v1760_v13 }
 0x212   : > { %v1313_v18 = vpop.f32.mrb[84].mxu0  ;;  %v1569_v19 = vpop.f32.mrb[84].mxu1 }
 0x213   : > { %3281 = vst [vmem:[%s4099_s25 + $0xa0] sm:$0xff] %v3045_v16   ;;  %3313 = vst [vmem:[%s4099_s25 + $0x1a0] sm:$0xff] %v3205_v17   ;;  %v1314_v20 = vadd.f32 %v4088_v63, %v1313_v18  ;;  %v1570_v21 = vadd.f32 %v4088_v63, %v1569_v19  ;;  %v1315_v22 = vpop.f32.mrb[85].mxu0  ;;  %v1571_v23 = vpop.f32.mrb[85].mxu1 }
 0x214   : > { %v1316_v24 = vpop.f32.mrb[86].mxu0  ;;  %v1572_v25 = vpop.f32.mrb[86].mxu1 }
 0x215   : > { %v1317_v26 = vadd.f32 %v4088_v63, %v1316_v24  ;;  %v1573_v27 = vadd.f32 %v4088_v63, %v1572_v25  ;;  %v1318_v28 = vpop.f32.mrb[87].mxu0  ;;  %v1574_v29 = vpop.f32.mrb[87].mxu1  ;;  %v1698_v30 = vmax.f32 %v1314_v20, 0.0  ;;  %v1762_v31 = vmax.f32 %v1570_v21, 0.0 }
 0x217   : > { %v1699_v32 = vmax.f32 %v1317_v26, 0.0  ;;  %v1763_v33 = vmax.f32 %v1573_v27, 0.0 }
 0x219   : > { %v3050_v34 = vpack.c.bf16 %v1699_v32, %v1698_v30  ;;  %v3210_v35 = vpack.c.bf16 %v1763_v33, %v1762_v31 }
 0x21a   : > { %v1321_v36 = vpop.f32.mrb[88].mxu0  ;;  %v1577_v37 = vpop.f32.mrb[88].mxu1 }
 0x21b   : > { %3282 = vst [vmem:[%s4099_s25 + $0xa8] sm:$0xff] %v3050_v34   ;;  %3314 = vst [vmem:[%s4099_s25 + $0x1a8] sm:$0xff] %v3210_v35   ;;  %v1322_v38 = vadd.f32 %v4088_v63, %v1321_v36  ;;  %v1578_v39 = vadd.f32 %v4088_v63, %v1577_v37  ;;  %v1323_v40 = vpop.f32.mrb[89].mxu0  ;;  %v1579_v41 = vpop.f32.mrb[89].mxu1 }
 0x21c   : > { %v1324_v42 = vpop.f32.mrb[90].mxu0  ;;  %v1580_v43 = vpop.f32.mrb[90].mxu1 }
 0x21d   : > { %v1325_v44 = vadd.f32 %v4088_v63, %v1324_v42  ;;  %v1581_v45 = vadd.f32 %v4088_v63, %v1580_v43  ;;  %v1326_v46 = vpop.f32.mrb[91].mxu0  ;;  %v1582_v47 = vpop.f32.mrb[91].mxu1  ;;  %v1700_v48 = vmax.f32 %v1322_v38, 0.0  ;;  %v1764_v49 = vmax.f32 %v1578_v39, 0.0 }
 0x21f   : > { %v1701_v50 = vmax.f32 %v1325_v44, 0.0  ;;  %v1765_v51 = vmax.f32 %v1581_v45, 0.0 }
 0x221   : > { %v3055_v52 = vpack.c.bf16 %v1701_v50, %v1700_v48  ;;  %v3215_v53 = vpack.c.bf16 %v1765_v51, %v1764_v49 }
 0x222   : > { %v1329_v54 = vpop.f32.mrb[92].mxu0  ;;  %v1585_v55 = vpop.f32.mrb[92].mxu1 }
 0x223   : > { %3283 = vst [vmem:[%s4099_s25 + $0xb0] sm:$0xff] %v3055_v52   ;;  %3315 = vst [vmem:[%s4099_s25 + $0x1b0] sm:$0xff] %v3215_v53   ;;  %v1330_v56 = vadd.f32 %v4088_v63, %v1329_v54  ;;  %v1586_v57 = vadd.f32 %v4088_v63, %v1585_v55  ;;  %v1331_v58 = vpop.f32.mrb[93].mxu0  ;;  %v1587_v59 = vpop.f32.mrb[93].mxu1 }
 0x224   : > { %v1332_v60 = vpop.f32.mrb[94].mxu0  ;;  %v1588_v61 = vpop.f32.mrb[94].mxu1 }
 0x225   : > { %v1333_v62 = vadd.f32 %v4088_v63, %v1332_v60  ;;  %v1589_v0 = vadd.f32 %v4088_v63, %v1588_v61  ;;  %v1334_v1 = vpop.f32.mrb[95].mxu0  ;;  %v1590_v2 = vpop.f32.mrb[95].mxu1  ;;  %v1702_v3 = vmax.f32 %v1330_v56, 0.0  ;;  %v1766_v4 = vmax.f32 %v1586_v57, 0.0 }
 0x227   : > { %v1703_v5 = vmax.f32 %v1333_v62, 0.0  ;;  %v1767_v6 = vmax.f32 %v1589_v0, 0.0 }
 0x229   : > { %v3060_v7 = vpack.c.bf16 %v1703_v5, %v1702_v3  ;;  %v3220_v8 = vpack.c.bf16 %v1767_v6, %v1766_v4 }
 0x22a   : > { %v1337_v9 = vpop.f32.mrb[96].mxu0  ;;  %v1593_v10 = vpop.f32.mrb[96].mxu1 }
 0x22b   : > { %3284 = vst [vmem:[%s4099_s25 + $0xb8] sm:$0xff] %v3060_v7   ;;  %3316 = vst [vmem:[%s4099_s25 + $0x1b8] sm:$0xff] %v3220_v8   ;;  %v1338_v12 = vadd.f32 %v4258_v11, %v1337_v9  ;;  %v1594_v63 = vadd.f32 %v4258_v11, %v1593_v10  ;;  %v1339_v13 = vpop.f32.mrb[97].mxu0  ;;  %v1595_v14 = vpop.f32.mrb[97].mxu1 }
 0x22c   : > { %v1340_v15 = vpop.f32.mrb[98].mxu0  ;;  %v1596_v16 = vpop.f32.mrb[98].mxu1 }
 0x22d   : > { %v1341_v17 = vadd.f32 %v4258_v11, %v1340_v15  ;;  %v1597_v18 = vadd.f32 %v4258_v11, %v1596_v16  ;;  %v1342_v19 = vpop.f32.mrb[99].mxu0  ;;  %v1598_v20 = vpop.f32.mrb[99].mxu1  ;;  %v1704_v21 = vmax.f32 %v1338_v12, 0.0  ;;  %v1768_v22 = vmax.f32 %v1594_v63, 0.0 }
 0x22f   : > { %v1705_v23 = vmax.f32 %v1341_v17, 0.0  ;;  %v1769_v24 = vmax.f32 %v1597_v18, 0.0 }
 0x231   : > { %v3065_v25 = vpack.c.bf16 %v1705_v23, %v1704_v21  ;;  %v3225_v26 = vpack.c.bf16 %v1769_v24, %v1768_v22 }
 0x232   : > { %v1345_v27 = vpop.f32.mrb[100].mxu0  ;;  %v1601_v28 = vpop.f32.mrb[100].mxu1 }
 0x233   : > { %3285 = vst [vmem:[%s4099_s25 + $0xc0] sm:$0xff] %v3065_v25   ;;  %3317 = vst [vmem:[%s4099_s25 + $0x1c0] sm:$0xff] %v3225_v26   ;;  %v1346_v29 = vadd.f32 %v4258_v11, %v1345_v27  ;;  %v1602_v30 = vadd.f32 %v4258_v11, %v1601_v28  ;;  %v1347_v31 = vpop.f32.mrb[101].mxu0  ;;  %v1603_v32 = vpop.f32.mrb[101].mxu1 }
 0x234   : > { %v1348_v33 = vpop.f32.mrb[102].mxu0  ;;  %v1604_v34 = vpop.f32.mrb[102].mxu1 }
 0x235   : > { %v1349_v35 = vadd.f32 %v4258_v11, %v1348_v33  ;;  %v1605_v36 = vadd.f32 %v4258_v11, %v1604_v34  ;;  %v1350_v37 = vpop.f32.mrb[103].mxu0  ;;  %v1606_v38 = vpop.f32.mrb[103].mxu1  ;;  %v1706_v39 = vmax.f32 %v1346_v29, 0.0  ;;  %v1770_v40 = vmax.f32 %v1602_v30, 0.0 }
 0x237   : > { %v1707_v41 = vmax.f32 %v1349_v35, 0.0  ;;  %v1771_v42 = vmax.f32 %v1605_v36, 0.0 }
 0x239   : > { %v3070_v43 = vpack.c.bf16 %v1707_v41, %v1706_v39  ;;  %v3230_v44 = vpack.c.bf16 %v1771_v42, %v1770_v40 }
 0x23a   : > { %v1353_v45 = vpop.f32.mrb[104].mxu0  ;;  %v1609_v46 = vpop.f32.mrb[104].mxu1 }
 0x23b   : > { %3286 = vst [vmem:[%s4099_s25 + $0xc8] sm:$0xff] %v3070_v43   ;;  %3318 = vst [vmem:[%s4099_s25 + $0x1c8] sm:$0xff] %v3230_v44   ;;  %v1354_v47 = vadd.f32 %v4258_v11, %v1353_v45  ;;  %v1610_v48 = vadd.f32 %v4258_v11, %v1609_v46  ;;  %v1355_v49 = vpop.f32.mrb[105].mxu0  ;;  %v1611_v50 = vpop.f32.mrb[105].mxu1 }
 0x23c   : > { %v1356_v51 = vpop.f32.mrb[106].mxu0  ;;  %v1612_v52 = vpop.f32.mrb[106].mxu1 }
 0x23d   : > { %v1357_v53 = vadd.f32 %v4258_v11, %v1356_v51  ;;  %v1613_v54 = vadd.f32 %v4258_v11, %v1612_v52  ;;  %v1358_v55 = vpop.f32.mrb[107].mxu0  ;;  %v1614_v56 = vpop.f32.mrb[107].mxu1  ;;  %v1708_v57 = vmax.f32 %v1354_v47, 0.0  ;;  %v1772_v58 = vmax.f32 %v1610_v48, 0.0 }
 0x23f   : > { %v1709_v59 = vmax.f32 %v1357_v53, 0.0  ;;  %v1773_v60 = vmax.f32 %v1613_v54, 0.0 }
 0x241   : > { %v3075_v61 = vpack.c.bf16 %v1709_v59, %v1708_v57  ;;  %v3235_v62 = vpack.c.bf16 %v1773_v60, %v1772_v58 }
 0x242   : > { %v1361_v0 = vpop.f32.mrb[108].mxu0  ;;  %v1617_v1 = vpop.f32.mrb[108].mxu1 }
 0x243   : > { %3287 = vst [vmem:[%s4099_s25 + $0xd0] sm:$0xff] %v3075_v61   ;;  %3319 = vst [vmem:[%s4099_s25 + $0x1d0] sm:$0xff] %v3235_v62   ;;  %v1362_v2 = vadd.f32 %v4258_v11, %v1361_v0  ;;  %v1618_v3 = vadd.f32 %v4258_v11, %v1617_v1  ;;  %v1363_v4 = vpop.f32.mrb[109].mxu0  ;;  %v1619_v5 = vpop.f32.mrb[109].mxu1 }
 0x244   : > { %v1364_v6 = vpop.f32.mrb[110].mxu0  ;;  %v1620_v7 = vpop.f32.mrb[110].mxu1 }
 0x245   : > { %v1365_v8 = vadd.f32 %v4258_v11, %v1364_v6  ;;  %v1621_v9 = vadd.f32 %v4258_v11, %v1620_v7  ;;  %v1366_v10 = vpop.f32.mrb[111].mxu0  ;;  %v1622_v12 = vpop.f32.mrb[111].mxu1  ;;  %v1710_v63 = vmax.f32 %v1362_v2, 0.0  ;;  %v1774_v13 = vmax.f32 %v1618_v3, 0.0 }
 0x247   : > { %v1711_v14 = vmax.f32 %v1365_v8, 0.0  ;;  %v1775_v15 = vmax.f32 %v1621_v9, 0.0 }
 0x249   : > { %v3080_v16 = vpack.c.bf16 %v1711_v14, %v1710_v63  ;;  %v3240_v17 = vpack.c.bf16 %v1775_v15, %v1774_v13 }
 0x24a   : > { %v1369_v18 = vpop.f32.mrb[112].mxu0  ;;  %v1625_v19 = vpop.f32.mrb[112].mxu1 }
 0x24b   : > { %3288 = vst [vmem:[%s4099_s25 + $0xd8] sm:$0xff] %v3080_v16   ;;  %3320 = vst [vmem:[%s4099_s25 + $0x1d8] sm:$0xff] %v3240_v17   ;;  %v1370_v20 = vadd.f32 %v4258_v11, %v1369_v18  ;;  %v1626_v21 = vadd.f32 %v4258_v11, %v1625_v19  ;;  %v1371_v22 = vpop.f32.mrb[113].mxu0  ;;  %v1627_v23 = vpop.f32.mrb[113].mxu1 }
 0x24c   : > { %v1372_v24 = vpop.f32.mrb[114].mxu0  ;;  %v1628_v25 = vpop.f32.mrb[114].mxu1 }
 0x24d   : > { %v1373_v26 = vadd.f32 %v4258_v11, %v1372_v24  ;;  %v1629_v27 = vadd.f32 %v4258_v11, %v1628_v25  ;;  %v1374_v28 = vpop.f32.mrb[115].mxu0  ;;  %v1630_v29 = vpop.f32.mrb[115].mxu1  ;;  %v1712_v30 = vmax.f32 %v1370_v20, 0.0  ;;  %v1776_v31 = vmax.f32 %v1626_v21, 0.0 }
 0x24f   : > { %v1713_v32 = vmax.f32 %v1373_v26, 0.0  ;;  %v1777_v33 = vmax.f32 %v1629_v27, 0.0 }
 0x251   : > { %v3085_v34 = vpack.c.bf16 %v1713_v32, %v1712_v30  ;;  %v3245_v35 = vpack.c.bf16 %v1777_v33, %v1776_v31 }
 0x252   : > { %v1377_v36 = vpop.f32.mrb[116].mxu0  ;;  %v1633_v37 = vpop.f32.mrb[116].mxu1 }
 0x253   : > { %3289 = vst [vmem:[%s4099_s25 + $0xe0] sm:$0xff] %v3085_v34   ;;  %3321 = vst [vmem:[%s4099_s25 + $0x1e0] sm:$0xff] %v3245_v35   ;;  %v1378_v38 = vadd.f32 %v4258_v11, %v1377_v36  ;;  %v1634_v39 = vadd.f32 %v4258_v11, %v1633_v37  ;;  %v1379_v40 = vpop.f32.mrb[117].mxu0  ;;  %v1635_v41 = vpop.f32.mrb[117].mxu1 }
 0x254   : > { %v1380_v42 = vpop.f32.mrb[118].mxu0  ;;  %v1636_v43 = vpop.f32.mrb[118].mxu1 }
 0x255   : > { %v1381_v44 = vadd.f32 %v4258_v11, %v1380_v42  ;;  %v1637_v45 = vadd.f32 %v4258_v11, %v1636_v43  ;;  %v1382_v46 = vpop.f32.mrb[119].mxu0  ;;  %v1638_v47 = vpop.f32.mrb[119].mxu1  ;;  %v1714_v48 = vmax.f32 %v1378_v38, 0.0  ;;  %v1778_v49 = vmax.f32 %v1634_v39, 0.0 }
 0x257   : > { %v1715_v50 = vmax.f32 %v1381_v44, 0.0  ;;  %v1779_v51 = vmax.f32 %v1637_v45, 0.0 }
 0x259   : > { %v3090_v52 = vpack.c.bf16 %v1715_v50, %v1714_v48  ;;  %v3250_v53 = vpack.c.bf16 %v1779_v51, %v1778_v49 }
 0x25a   : > { %v1385_v54 = vpop.f32.mrb[120].mxu0  ;;  %v1641_v55 = vpop.f32.mrb[120].mxu1 }
 0x25b   : > { %3290 = vst [vmem:[%s4099_s25 + $0xe8] sm:$0xff] %v3090_v52   ;;  %3322 = vst [vmem:[%s4099_s25 + $0x1e8] sm:$0xff] %v3250_v53   ;;  %v1386_v56 = vadd.f32 %v4258_v11, %v1385_v54  ;;  %v1642_v57 = vadd.f32 %v4258_v11, %v1641_v55  ;;  %v1387_v58 = vpop.f32.mrb[121].mxu0  ;;  %v1643_v59 = vpop.f32.mrb[121].mxu1 }
 0x25c   : > { %v1388_v60 = vpop.f32.mrb[122].mxu0  ;;  %v1644_v61 = vpop.f32.mrb[122].mxu1 }
 0x25d   : > { %v1389_v62 = vadd.f32 %v4258_v11, %v1388_v60  ;;  %v1645_v0 = vadd.f32 %v4258_v11, %v1644_v61  ;;  %v1390_v1 = vpop.f32.mrb[123].mxu0  ;;  %v1646_v2 = vpop.f32.mrb[123].mxu1  ;;  %v1716_v3 = vmax.f32 %v1386_v56, 0.0  ;;  %v1780_v4 = vmax.f32 %v1642_v57, 0.0 }
 0x25f   : > { %v1717_v5 = vmax.f32 %v1389_v62, 0.0  ;;  %v1781_v6 = vmax.f32 %v1645_v0, 0.0 }
 0x261   : > { %v3095_v7 = vpack.c.bf16 %v1717_v5, %v1716_v3  ;;  %v3255_v8 = vpack.c.bf16 %v1781_v6, %v1780_v4 }
 0x262   : > { %v1393_v9 = vpop.f32.mrb[124].mxu0  ;;  %v1649_v10 = vpop.f32.mrb[124].mxu1 }
 0x263   : > { %3291 = vst [vmem:[%s4099_s25 + $0xf0] sm:$0xff] %v3095_v7   ;;  %3323 = vst [vmem:[%s4099_s25 + $0x1f0] sm:$0xff] %v3255_v8   ;;  %v1394_v12 = vadd.f32 %v4258_v11, %v1393_v9  ;;  %v1650_v63 = vadd.f32 %v4258_v11, %v1649_v10  ;;  %v1395_v13 = vpop.f32.mrb[125].mxu0  ;;  %v1651_v14 = vpop.f32.mrb[125].mxu1 }
 0x264   : > { %v1396_v15 = vpop.f32.mrb[126].mxu0  ;;  %v1652_v16 = vpop.f32.mrb[126].mxu1 }
 0x265   : > { %v1397_v17 = vadd.f32 %v4258_v11, %v1396_v15  ;;  %v1653_v18 = vadd.f32 %v4258_v11, %v1652_v16  ;;  %v1398_v19 = vpop.f32.mrb[127].mxu0  ;;  %v1654_v20 = vpop.f32.mrb[127].mxu1  ;;  %v1718_v21 = vmax.f32 %v1394_v12, 0.0  ;;  %v1782_v22 = vmax.f32 %v1650_v63, 0.0 }
 0x267   : > { %v1719_v23 = vmax.f32 %v1397_v17, 0.0  ;;  %v1783_v24 = vmax.f32 %v1653_v18, 0.0 }
 0x269   : > { %v3100_v11 = vpack.c.bf16 %v1719_v23, %v1718_v21  ;;  %v3260_v25 = vpack.c.bf16 %v1783_v24, %v1782_v22 }
 0x26b   : > { %3292 = vst [vmem:[%s4099_s25 + $0xf8] sm:$0xff] %v3100_v11   ;;  %3324 = vst [vmem:[%s4099_s25 + $0x1f8] sm:$0xff] %v3260_v25  }
 0x26c   : > { %3701 = shalt.err (!%p3698_p7)
}
 0x26d   : > { %s3702_s8 = scalar_lea.hbm %s4311_s29, 8192  ;;  %s3706_s20 = scalar_lea.hbm %s4362_s3, 16384 }
 0x26e   : > { %p3703_p9 = scmp.ne.s32.totalorder %s4311_s29, %s3702_s8  ;;  %p3707_p5 = scmp.lt.u32.totalorder %s4311_s29, %s4362_s3 }
 0x26f   : > { %p3708_p11 = scmp.lt.u32.totalorder %s3706_s20, %s3702_s8  ;;  %p3710_p4 = scmp.lt.u32.totalorder %s3702_s8, %s4311_s29 }
 0x270   : > { %p3704_p2 = pnand %p3703_p9, %p3881_p12 }
 0x271   : > { %p3709_p1 = por %p3708_p11, %p3707_p5 }
 0x272   : > { %p3705_p0 = pneg %p3704_p2 }
 0x273   : > { %p3711_p6 = por %p3710_p4, %p3709_p1 }
 0x275   : > { %p3712_p8 = pnand %p3711_p6, %p3705_p0 }
 0x277   : > { %3715 = shalt.err (!%p3712_p8)
}
 0x278   : > { %s3768_s26 = smov 64   ;;  %s3769_s5 = smov 4  }
 0x279   : > { %3363 = dma.vmem_to_hbm [thread:$0]  (%p3881_p12), %s4313_s11, 8192, %s4311_s29, %s2425_s16, %s3768_s26, %s3768_s26, %s3769_s5  }
 0x27a PF: > { %s2453_s10 = sand.u32 1, %s3746_s12   ;;  %p4377_p10 = scmp.ne.s32.totalorder %s4367_s19, 0 }
 0x27b   : > { %p4378_p13 = scmp.ge.s32.totalorder %s3758_s15, 2  ;;  %s2454_s27 = scalar_lea.sflag [#allocation4], %s2453_s10 }
 0x27d   : > { %p3374_p3 = pnand %p4378_p13, %p4377_p10 }
 0x27f   : > { %3741 = dma.done.wait (!%p3374_p3), %s2454_s27, 8192  }
 0x280   : > { %3743 = vsyncadd (!%p3374_p3), %s2454_s27, 4294959104  ;;  %p17_p7 = scmp.ge.s32.totalorder %s3846_s24, 4   ;;  %s4379_s12 = smov %s3750_s13 }
 0x281   : > { %s4380_s13 = smov %s3754_s14  ;;  %s4381_s14 = smov %s3877_s17 }
 0x282   : > { %s4382_s15 = smov %s3846_s24  ;;  %19 = sbr.rel (!%p17_p7) target bundleno = 6 (0x6), region = 81 }
 0x289   :  { %2459 = vsyncpa [#allocation3], 1 }
 0x28a   :  { %2461 = vsyncpa [#allocation3 + $0x1], 1 }
 0x28b   :  { %2462 = vsyncpa [#allocation6], 1 }
 0x28c   :  { %2463 = vsyncpa [#allocation4], 1 }
 0x28d   :  { %2465 = vsyncpa [#allocation4 + $0x1], 1 }

</bundles_post_ra>
